<compile_context>
chip_gen: v6e
topology: v6e:2x2x1
jax: 0.10.0
libtpu: 0.0.40
codegen_flags: <defaults>
</compile_context>

<pallas_src>
import functools

import jax
import jax.numpy as jnp
from jax import lax
from jax.experimental import pallas as pl
from jax.experimental.pallas import tpu as pltpu


def _residual131_kernel(x_ref, w1_ref, b1_ref, w2_ref, b2_ref, w3_ref, b3_ref,
                        o_ref, *, H, W, alpha):
    """One lane-folded batch chunk per grid step.

    x_ref  : (Cin,  L)        L = images_per_step * H*W, lane-dense
    w1_ref : (Cint, Cin)      1x1 conv weights with BN1 scale folded in
    b1_ref : (Cint, 1)        folded BN1 shift
    w2_ref : (Cint, 9*Cint)   3x3 conv weights, tap-major, BN2 scale folded in
    b2_ref : (Cint, 1)        folded BN2 shift
    w3_ref : (Cout, Cint)     1x1 conv weights with BN3 scale folded in
    b3_ref : (Cout, 1)        folded BN3 shift
    o_ref  : (Cout, L)
    """
    HW = H * W
    x = x_ref[...]                                  # (Cin, L) f32
    cin, L = x.shape
    w1 = w1_ref[...]
    cint = w1.shape[0]

    # ---- stage 1: 1x1 conv + folded BN1 as Cin VPU FMAs, bias in first FMA --
    y1 = w1[:, 0:1] * x[0:1, :] + b1_ref[...]
    for ci in range(1, cin):
        y1 = y1 + w1[:, ci:ci + 1] * x[ci:ci + 1, :]
    a1 = jnp.clip(y1, 0.0, alpha)                   # PACT clamp, (Cint, L)

    # ---- stage 2: 3x3 conv (pad 1, stride 1) + folded BN2, pure VPU taps ----
    # Each tap (dh, dw) is a static lane roll of the flattened planes plus a
    # per-image border mask (pos is position WITHIN the image so folded images
    # never bleed into each other).  9 taps x Cint channels of exact-f32 FMAs.
    pos = lax.broadcasted_iota(jnp.int32, (1, L), 1) % HW
    col = pos % W
    up_ok = pos >= W
    down_ok = pos < (H - 1) * W
    left_ok = col >= 1
    right_ok = col < (W - 1)

    w2 = w2_ref[...]                                # (Cint, 9*Cint)
    b2 = b2_ref[...]
    y2 = None
    tap = 0
    for dh in (-1, 0, 1):
        for dw in (-1, 0, 1):
            s = dh * W + dw                         # flat-index offset of tap
            p = a1 if s == 0 else jnp.roll(a1, -s, axis=1)
            m = None
            if dh == -1:
                m = up_ok
            elif dh == 1:
                m = down_ok
            if dw == -1:
                m = left_ok if m is None else jnp.logical_and(m, left_ok)
            elif dw == 1:
                m = right_ok if m is None else jnp.logical_and(m, right_ok)
            if m is not None:
                p = jnp.where(m, p, 0.0)
            base = tap * cint
            for ci in range(cint):
                term = w2[:, base + ci:base + ci + 1] * p[ci:ci + 1, :]
                y2 = (term + b2) if y2 is None else (y2 + term)
            tap += 1
    a2 = jnp.clip(y2, 0.0, alpha)                   # (Cint, L)

    # ---- stage 3: 1x1 conv + folded BN3 as Cint VPU FMAs --------------------
    w3 = w3_ref[...]
    y3 = w3[:, 0:1] * a2[0:1, :] + b3_ref[...]
    for ci in range(1, cint):
        y3 = y3 + w3[:, ci:ci + 1] * a2[ci:ci + 1, :]

    o_ref[...] = y3.astype(o_ref.dtype)             # lane-dense, unmasked store


def fold_residual131_params(w1, w2, w3, bn1, bn2, bn3, eps=1e-3):
    """Fold BN scale into conv weights and BN shift into per-channel biases.

    Call ONCE (outside the per-step forward path) and reuse the result.
    w1: (Cint,Cin,1,1), w2: (Cint,Cint,3,3), w3: (Cout,Cint,1,1),
    bnX = (gamma, beta, running_mean, running_var).
    """
    def fold(wconv_2d, bn_p):
        g, b, m, v = bn_p
        s = g / jnp.sqrt(v + eps)
        return s[:, None] * wconv_2d, (b - m * s)[:, None]

    cint = w1.shape[0]
    w1f, b1f = fold(w1[:, :, 0, 0], bn1)                       # (Cint,Cin),(Cint,1)
    w3f, b3f = fold(w3[:, :, 0, 0], bn3)                       # (Cout,Cint),(Cout,1)
    g2, be2, m2, v2 = bn2
    s2 = g2 / jnp.sqrt(v2 + eps)
    w2s = s2[:, None, None, None] * w2                         # (Cint,Cint,3,3)
    # tap-major repack: column index = (kh*3 + kw)*Cint + ci, matching the kernel
    w2f = jnp.transpose(w2s, (0, 2, 3, 1)).reshape(cint, 9 * cint)
    b2f = (be2 - m2 * s2)[:, None]
    return w1f, b1f, w2f, b2f, w3f, b3f


@functools.partial(jax.jit, static_argnames=("alpha", "num_steps"))
def quant_residual131_forward(x, w1f, b1f, w2f, b2f, w3f, b3f,
                              *, alpha=123.0, num_steps=1):
    """x: (N, Cin, H, W) NCHW; remaining args from fold_residual131_params.

    num_steps=1 folds the whole batch into one grid step (best on single-TC
    v5e/v6e); on v7x use num_steps=2 so the megacore splits the batch.
    """
    N, Cin, H, W = x.shape
    HW = H * W
    Cint = w1f.shape[0]
    Cout = w3f.shape[0]
    assert N % num_steps == 0
    L = (N // num_steps) * HW

    # NCHW -> channel-major lane-folded (Cin, N*H*W): all images side-by-side
    # on the lane axis so a single grid step covers the whole batch.
    x_k = jnp.transpose(x.reshape(N, Cin, HW), (1, 0, 2)).reshape(Cin, N * HW)

    kernel = functools.partial(_residual131_kernel, H=H, W=W, alpha=float(alpha))

    out = pl.pallas_call(
        kernel,
        out_shape=jax.ShapeDtypeStruct((Cout, N * HW), x.dtype),
        grid_spec=pl.GridSpec(
            grid=(num_steps,),
            in_specs=[
                pl.BlockSpec((Cin, L), lambda g: (0, g)),
                pl.BlockSpec((Cint, Cin), lambda g: (0, 0)),
                pl.BlockSpec((Cint, 1), lambda g: (0, 0)),
                pl.BlockSpec((Cint, 9 * Cint), lambda g: (0, 0)),
                pl.BlockSpec((Cint, 1), lambda g: (0, 0)),
                pl.BlockSpec((Cout, Cint), lambda g: (0, 0)),
                pl.BlockSpec((Cout, 1), lambda g: (0, 0)),
            ],
            out_specs=pl.BlockSpec((Cout, L), lambda g: (0, g)),
        ),
        compiler_params=pltpu.CompilerParams(
            dimension_semantics=("parallel",)),
    )(x_k, w1f, b1f, w2f, b2f, w3f, b3f)

    # (Cout, N*H*W) -> NCHW
    return jnp.transpose(out.reshape(Cout, N, HW), (1, 0, 2)).reshape(N, Cout, H, W)


def _reference(x, w1, w2, w3, bn1, bn2, bn3, alpha=123.0, eps=1e-3):
    def bn_apply(y, p):
        g, b, m, v = p
        s = g / jnp.sqrt(v + eps)
        return y * s[None, :, None, None] + (b - m * s)[None, :, None, None]

    def conv(y, w, pad):
        return lax.conv_general_dilated(
            y, w, window_strides=(1, 1),
            padding=((pad, pad), (pad, pad)),
            dimension_numbers=("NCHW", "OIHW", "NCHW"),
            precision=lax.Precision.HIGHEST)

    y = jnp.clip(bn_apply(conv(x, w1, 0), bn1), 0.0, alpha)
    y = jnp.clip(bn_apply(conv(y, w2, 1), bn2), 0.0, alpha)
    y = bn_apply(conv(y, w3, 0), bn3)
    return y


if __name__ == "__main__":
    key = jax.random.PRNGKey(0)
    ks = jax.random.split(key, 8)

    N, Cin, Cint, Cout, H, W = 2, 4, 4, 8, 16, 16
    alpha = 1.0  # PACT clamp ceiling (constructor arg; small so it is exercised)

    x = jax.random.normal(ks[0], (N, Cin, H, W), jnp.float32)

    # deterministic synthetic parameters (not a checkpoint)
    w1 = jax.random.normal(ks[1], (Cint, Cin, 1, 1), jnp.float32) * 0.5
    w2 = jax.random.normal(ks[2], (Cint, Cint, 3, 3), jnp.float32) * 0.3
    w3 = jax.random.normal(ks[3], (Cout, Cint, 1, 1), jnp.float32) * 0.5

    def make_bn(k, c):
        k1, k2, k3, k4 = jax.random.split(k, 4)
        gamma = 1.0 + 0.1 * jax.random.normal(k1, (c,), jnp.float32)
        beta = 0.1 * jax.random.normal(k2, (c,), jnp.float32)
        mean = 0.1 * jax.random.normal(k3, (c,), jnp.float32)
        var = jnp.abs(1.0 + 0.1 * jax.random.normal(k4, (c,), jnp.float32))
        return gamma, beta, mean, var

    bn1 = make_bn(ks[4], Cint)
    bn2 = make_bn(ks[5], Cint)
    bn3 = make_bn(ks[6], Cout)

    # BN folding done once, outside the per-call forward path.
    folded = fold_residual131_params(w1, w2, w3, bn1, bn2, bn3)

    out = quant_residual131_forward(x, *folded, alpha=alpha, num_steps=1)
    out = jax.block_until_ready(out)

    ref = _reference(x, w1, w2, w3, bn1, bn2, bn3, alpha=alpha)
    assert out.shape == (N, Cout, H, W)
    max_err = float(jnp.max(jnp.abs(out - ref)))
    assert jnp.allclose(out, ref, atol=2e-3, rtol=2e-3), max_err
    print("KERNEL_OK")
</pallas_src>

<mosaic_0001>
module attributes {stable_mosaic.version = 11 : i64} {
  func.func @_residual131_kernel(%arg0: i32, %arg1: memref<4x512xf32, #tpu.memory_space<vmem>>, %arg2: memref<4x4xf32, #tpu.memory_space<vmem>>, %arg3: memref<4x1xf32, #tpu.memory_space<vmem>>, %arg4: memref<4x36xf32, #tpu.memory_space<vmem>>, %arg5: memref<4x1xf32, #tpu.memory_space<vmem>>, %arg6: memref<8x4xf32, #tpu.memory_space<vmem>>, %arg7: memref<8x1xf32, #tpu.memory_space<vmem>>, %arg8: memref<8x512xf32, #tpu.memory_space<vmem>>) attributes {dimension_semantics = [#tpu.dimension_semantics<parallel>], iteration_bounds = array<i64: 1>, scalar_prefetch = 0 : i64, scratch_operands = 0 : i64, tpu.core_type = #tpu.core_type<tc>, window_params = [{transform_indices = @transform_0, window_bounds = array<i64: 4, 512>}, {pipeline_mode = #tpu.pipeline_mode<synchronous>, transform_indices = @transform_1, window_bounds = array<i64: 4, 4>}, {pipeline_mode = #tpu.pipeline_mode<synchronous>, transform_indices = @transform_2, window_bounds = array<i64: 4, 1>}, {pipeline_mode = #tpu.pipeline_mode<synchronous>, transform_indices = @transform_3, window_bounds = array<i64: 4, 36>}, {pipeline_mode = #tpu.pipeline_mode<synchronous>, transform_indices = @transform_4, window_bounds = array<i64: 4, 1>}, {pipeline_mode = #tpu.pipeline_mode<synchronous>, transform_indices = @transform_5, window_bounds = array<i64: 8, 4>}, {pipeline_mode = #tpu.pipeline_mode<synchronous>, transform_indices = @transform_6, window_bounds = array<i64: 8, 1>}, {transform_indices = @transform_7, window_bounds = array<i64: 8, 512>}]} {
    %c0 = arith.constant 0 : index
    %c0_0 = arith.constant 0 : index
    %0 = vector.load %arg1[%c0, %c0_0] : memref<4x512xf32, #tpu.memory_space<vmem>>, vector<4x512xf32>
    %c0_1 = arith.constant 0 : index
    %c0_2 = arith.constant 0 : index
    %1 = vector.load %arg2[%c0_1, %c0_2] : memref<4x4xf32, #tpu.memory_space<vmem>>, vector<4x4xf32>
    %2 = vector.extract_strided_slice %1 {offsets = [0, 0], sizes = [4, 1], strides = [1, 1]} : vector<4x4xf32> to vector<4x1xf32>
    %3 = vector.extract_strided_slice %0 {offsets = [0, 0], sizes = [1, 512], strides = [1, 1]} : vector<4x512xf32> to vector<1x512xf32>
    %4 = vector.broadcast %2 : vector<4x1xf32> to vector<4x512xf32>
    %5 = vector.broadcast %3 : vector<1x512xf32> to vector<4x512xf32>
    %6 = arith.mulf %4, %5 : vector<4x512xf32>
    %c0_3 = arith.constant 0 : index
    %c0_4 = arith.constant 0 : index
    %7 = vector.load %arg3[%c0_3, %c0_4] : memref<4x1xf32, #tpu.memory_space<vmem>>, vector<4x1xf32>
    %8 = vector.broadcast %7 : vector<4x1xf32> to vector<4x512xf32>
    %9 = arith.addf %6, %8 : vector<4x512xf32>
    %10 = vector.extract_strided_slice %1 {offsets = [0, 1], sizes = [4, 1], strides = [1, 1]} : vector<4x4xf32> to vector<4x1xf32>
    %11 = vector.extract_strided_slice %0 {offsets = [1, 0], sizes = [1, 512], strides = [1, 1]} : vector<4x512xf32> to vector<1x512xf32>
    %12 = vector.broadcast %10 : vector<4x1xf32> to vector<4x512xf32>
    %13 = vector.broadcast %11 : vector<1x512xf32> to vector<4x512xf32>
    %14 = arith.mulf %12, %13 : vector<4x512xf32>
    %15 = arith.addf %9, %14 : vector<4x512xf32>
    %16 = vector.extract_strided_slice %1 {offsets = [0, 2], sizes = [4, 1], strides = [1, 1]} : vector<4x4xf32> to vector<4x1xf32>
    %17 = vector.extract_strided_slice %0 {offsets = [2, 0], sizes = [1, 512], strides = [1, 1]} : vector<4x512xf32> to vector<1x512xf32>
    %18 = vector.broadcast %16 : vector<4x1xf32> to vector<4x512xf32>
    %19 = vector.broadcast %17 : vector<1x512xf32> to vector<4x512xf32>
    %20 = arith.mulf %18, %19 : vector<4x512xf32>
    %21 = arith.addf %15, %20 : vector<4x512xf32>
    %22 = vector.extract_strided_slice %1 {offsets = [0, 3], sizes = [4, 1], strides = [1, 1]} : vector<4x4xf32> to vector<4x1xf32>
    %23 = vector.extract_strided_slice %0 {offsets = [3, 0], sizes = [1, 512], strides = [1, 1]} : vector<4x512xf32> to vector<1x512xf32>
    %24 = vector.broadcast %22 : vector<4x1xf32> to vector<4x512xf32>
    %25 = vector.broadcast %23 : vector<1x512xf32> to vector<4x512xf32>
    %26 = arith.mulf %24, %25 : vector<4x512xf32>
    %27 = arith.addf %21, %26 : vector<4x512xf32>
    %cst = arith.constant 0.000000e+00 : f32
    %cst_5 = arith.constant 1.000000e+00 : f32
    %28 = vector.broadcast %cst : f32 to vector<4x512xf32>
    %29 = arith.maximumf %28, %27 : vector<4x512xf32>
    %30 = vector.broadcast %cst_5 : f32 to vector<4x512xf32>
    %31 = arith.minimumf %30, %29 : vector<4x512xf32>
    %32 = tpu.iota {dimensions = array<i32: 1>} : vector<1x512xi32>
    %c256_i32 = arith.constant 256 : i32
    %c0_i32 = arith.constant 0 : i32
    %33 = arith.cmpi eq, %c256_i32, %c0_i32 : i32
    %c1_i32 = arith.constant 1 : i32
    %34 = arith.select %33, %c1_i32, %c256_i32 : i32
    %35 = vector.broadcast %34 : i32 to vector<1x512xi32>
    %36 = arith.remsi %32, %35 : vector<1x512xi32>
    %c0_i32_6 = arith.constant 0 : i32
    %37 = vector.broadcast %c0_i32_6 : i32 to vector<1x512xi32>
    %38 = arith.cmpi ne, %36, %37 : vector<1x512xi32>
    %c0_i32_7 = arith.constant 0 : i32
    %39 = vector.broadcast %c0_i32_7 : i32 to vector<1x512xi32>
    %40 = arith.cmpi slt, %36, %39 : vector<1x512xi32>
    %c0_i32_8 = arith.constant 0 : i32
    %41 = arith.cmpi slt, %34, %c0_i32_8 : i32
    %42 = vector.broadcast %41 : i1 to vector<1x512xi1>
    %43 = vector.broadcast %42 : vector<1x512xi1> to vector<1x512xi1>
    %44 = arith.xori %40, %43 : vector<1x512xi1>
    %45 = arith.andi %44, %38 : vector<1x512xi1>
    %46 = vector.broadcast %34 : i32 to vector<1x512xi32>
    %47 = arith.addi %36, %46 : vector<1x512xi32>
    %48 = arith.select %45, %47, %36 : vector<1x512xi1>, vector<1x512xi32>
    %c16_i32 = arith.constant 16 : i32
    %c0_i32_9 = arith.constant 0 : i32
    %49 = arith.cmpi eq, %c16_i32, %c0_i32_9 : i32
    %c1_i32_10 = arith.constant 1 : i32
    %50 = arith.select %49, %c1_i32_10, %c16_i32 : i32
    %51 = vector.broadcast %50 : i32 to vector<1x512xi32>
    %52 = arith.remsi %48, %51 : vector<1x512xi32>
    %c0_i32_11 = arith.constant 0 : i32
    %53 = vector.broadcast %c0_i32_11 : i32 to vector<1x512xi32>
    %54 = arith.cmpi ne, %52, %53 : vector<1x512xi32>
    %c0_i32_12 = arith.constant 0 : i32
    %55 = vector.broadcast %c0_i32_12 : i32 to vector<1x512xi32>
    %56 = arith.cmpi slt, %52, %55 : vector<1x512xi32>
    %c0_i32_13 = arith.constant 0 : i32
    %57 = arith.cmpi slt, %50, %c0_i32_13 : i32
    %58 = vector.broadcast %57 : i1 to vector<1x512xi1>
    %59 = vector.broadcast %58 : vector<1x512xi1> to vector<1x512xi1>
    %60 = arith.xori %56, %59 : vector<1x512xi1>
    %61 = arith.andi %60, %54 : vector<1x512xi1>
    %62 = vector.broadcast %50 : i32 to vector<1x512xi32>
    %63 = arith.addi %52, %62 : vector<1x512xi32>
    %64 = arith.select %61, %63, %52 : vector<1x512xi1>, vector<1x512xi32>
    %c16_i32_14 = arith.constant 16 : i32
    %65 = vector.broadcast %c16_i32_14 : i32 to vector<1x512xi32>
    %66 = arith.cmpi sge, %48, %65 : vector<1x512xi32>
    %c240_i32 = arith.constant 240 : i32
    %67 = vector.broadcast %c240_i32 : i32 to vector<1x512xi32>
    %68 = arith.cmpi slt, %48, %67 : vector<1x512xi32>
    %c1_i32_15 = arith.constant 1 : i32
    %69 = vector.broadcast %c1_i32_15 : i32 to vector<1x512xi32>
    %70 = arith.cmpi sge, %64, %69 : vector<1x512xi32>
    %c15_i32 = arith.constant 15 : i32
    %71 = vector.broadcast %c15_i32 : i32 to vector<1x512xi32>
    %72 = arith.cmpi slt, %64, %71 : vector<1x512xi32>
    %c0_16 = arith.constant 0 : index
    %c0_17 = arith.constant 0 : index
    %73 = vector.load %arg4[%c0_16, %c0_17] : memref<4x36xf32, #tpu.memory_space<vmem>>, vector<4x36xf32>
    %c0_18 = arith.constant 0 : index
    %c0_19 = arith.constant 0 : index
    %74 = vector.load %arg5[%c0_18, %c0_19] : memref<4x1xf32, #tpu.memory_space<vmem>>, vector<4x1xf32>
    %75 = vector.extract_strided_slice %31 {offsets = [0, 495], sizes = [4, 17], strides = [1, 1]} : vector<4x512xf32> to vector<4x17xf32>
    %76 = vector.extract_strided_slice %31 {offsets = [0, 0], sizes = [4, 495], strides = [1, 1]} : vector<4x512xf32> to vector<4x495xf32>
    %77 = tpu.concatenate %75, %76 in 1 : vector<4x17xf32>, vector<4x495xf32> -> vector<4x512xf32>
    %78 = arith.andi %66, %70 : vector<1x512xi1>
    %cst_20 = arith.constant 0.000000e+00 : f32
    %79 = vector.shape_cast %78 : vector<1x512xi1> to vector<1x512xi1>
    %80 = vector.broadcast %79 : vector<1x512xi1> to vector<4x512xi1>
    %81 = vector.broadcast %cst_20 : f32 to vector<4x512xf32>
    %82 = arith.select %80, %77, %81 : vector<4x512xi1>, vector<4x512xf32>
    %83 = vector.extract_strided_slice %73 {offsets = [0, 0], sizes = [4, 1], strides = [1, 1]} : vector<4x36xf32> to vector<4x1xf32>
    %84 = vector.extract_strided_slice %82 {offsets = [0, 0], sizes = [1, 512], strides = [1, 1]} : vector<4x512xf32> to vector<1x512xf32>
    %85 = vector.broadcast %83 : vector<4x1xf32> to vector<4x512xf32>
    %86 = vector.broadcast %84 : vector<1x512xf32> to vector<4x512xf32>
    %87 = arith.mulf %85, %86 : vector<4x512xf32>
    %88 = vector.broadcast %74 : vector<4x1xf32> to vector<4x512xf32>
    %89 = arith.addf %87, %88 : vector<4x512xf32>
    %90 = vector.extract_strided_slice %73 {offsets = [0, 1], sizes = [4, 1], strides = [1, 1]} : vector<4x36xf32> to vector<4x1xf32>
    %91 = vector.extract_strided_slice %82 {offsets = [1, 0], sizes = [1, 512], strides = [1, 1]} : vector<4x512xf32> to vector<1x512xf32>
    %92 = vector.broadcast %90 : vector<4x1xf32> to vector<4x512xf32>
    %93 = vector.broadcast %91 : vector<1x512xf32> to vector<4x512xf32>
    %94 = arith.mulf %92, %93 : vector<4x512xf32>
    %95 = arith.addf %89, %94 : vector<4x512xf32>
    %96 = vector.extract_strided_slice %73 {offsets = [0, 2], sizes = [4, 1], strides = [1, 1]} : vector<4x36xf32> to vector<4x1xf32>
    %97 = vector.extract_strided_slice %82 {offsets = [2, 0], sizes = [1, 512], strides = [1, 1]} : vector<4x512xf32> to vector<1x512xf32>
    %98 = vector.broadcast %96 : vector<4x1xf32> to vector<4x512xf32>
    %99 = vector.broadcast %97 : vector<1x512xf32> to vector<4x512xf32>
    %100 = arith.mulf %98, %99 : vector<4x512xf32>
    %101 = arith.addf %95, %100 : vector<4x512xf32>
    %102 = vector.extract_strided_slice %73 {offsets = [0, 3], sizes = [4, 1], strides = [1, 1]} : vector<4x36xf32> to vector<4x1xf32>
    %103 = vector.extract_strided_slice %82 {offsets = [3, 0], sizes = [1, 512], strides = [1, 1]} : vector<4x512xf32> to vector<1x512xf32>
    %104 = vector.broadcast %102 : vector<4x1xf32> to vector<4x512xf32>
    %105 = vector.broadcast %103 : vector<1x512xf32> to vector<4x512xf32>
    %106 = arith.mulf %104, %105 : vector<4x512xf32>
    %107 = arith.addf %101, %106 : vector<4x512xf32>
    %108 = vector.extract_strided_slice %31 {offsets = [0, 496], sizes = [4, 16], strides = [1, 1]} : vector<4x512xf32> to vector<4x16xf32>
    %109 = vector.extract_strided_slice %31 {offsets = [0, 0], sizes = [4, 496], strides = [1, 1]} : vector<4x512xf32> to vector<4x496xf32>
    %110 = tpu.concatenate %108, %109 in 1 : vector<4x16xf32>, vector<4x496xf32> -> vector<4x512xf32>
    %cst_21 = arith.constant 0.000000e+00 : f32
    %111 = vector.shape_cast %66 : vector<1x512xi1> to vector<1x512xi1>
    %112 = vector.broadcast %111 : vector<1x512xi1> to vector<4x512xi1>
    %113 = vector.broadcast %cst_21 : f32 to vector<4x512xf32>
    %114 = arith.select %112, %110, %113 : vector<4x512xi1>, vector<4x512xf32>
    %115 = vector.extract_strided_slice %73 {offsets = [0, 4], sizes = [4, 1], strides = [1, 1]} : vector<4x36xf32> to vector<4x1xf32>
    %116 = vector.extract_strided_slice %114 {offsets = [0, 0], sizes = [1, 512], strides = [1, 1]} : vector<4x512xf32> to vector<1x512xf32>
    %117 = vector.broadcast %115 : vector<4x1xf32> to vector<4x512xf32>
    %118 = vector.broadcast %116 : vector<1x512xf32> to vector<4x512xf32>
    %119 = arith.mulf %117, %118 : vector<4x512xf32>
    %120 = arith.addf %107, %119 : vector<4x512xf32>
    %121 = vector.extract_strided_slice %73 {offsets = [0, 5], sizes = [4, 1], strides = [1, 1]} : vector<4x36xf32> to vector<4x1xf32>
    %122 = vector.extract_strided_slice %114 {offsets = [1, 0], sizes = [1, 512], strides = [1, 1]} : vector<4x512xf32> to vector<1x512xf32>
    %123 = vector.broadcast %121 : vector<4x1xf32> to vector<4x512xf32>
    %124 = vector.broadcast %122 : vector<1x512xf32> to vector<4x512xf32>
    %125 = arith.mulf %123, %124 : vector<4x512xf32>
    %126 = arith.addf %120, %125 : vector<4x512xf32>
    %127 = vector.extract_strided_slice %73 {offsets = [0, 6], sizes = [4, 1], strides = [1, 1]} : vector<4x36xf32> to vector<4x1xf32>
    %128 = vector.extract_strided_slice %114 {offsets = [2, 0], sizes = [1, 512], strides = [1, 1]} : vector<4x512xf32> to vector<1x512xf32>
    %129 = vector.broadcast %127 : vector<4x1xf32> to vector<4x512xf32>
    %130 = vector.broadcast %128 : vector<1x512xf32> to vector<4x512xf32>
    %131 = arith.mulf %129, %130 : vector<4x512xf32>
    %132 = arith.addf %126, %131 : vector<4x512xf32>
    %133 = vector.extract_strided_slice %73 {offsets = [0, 7], sizes = [4, 1], strides = [1, 1]} : vector<4x36xf32> to vector<4x1xf32>
    %134 = vector.extract_strided_slice %114 {offsets = [3, 0], sizes = [1, 512], strides = [1, 1]} : vector<4x512xf32> to vector<1x512xf32>
    %135 = vector.broadcast %133 : vector<4x1xf32> to vector<4x512xf32>
    %136 = vector.broadcast %134 : vector<1x512xf32> to vector<4x512xf32>
    %137 = arith.mulf %135, %136 : vector<4x512xf32>
    %138 = arith.addf %132, %137 : vector<4x512xf32>
    %139 = vector.extract_strided_slice %31 {offsets = [0, 497], sizes = [4, 15], strides = [1, 1]} : vector<4x512xf32> to vector<4x15xf32>
    %140 = vector.extract_strided_slice %31 {offsets = [0, 0], sizes = [4, 497], strides = [1, 1]} : vector<4x512xf32> to vector<4x497xf32>
    %141 = tpu.concatenate %139, %140 in 1 : vector<4x15xf32>, vector<4x497xf32> -> vector<4x512xf32>
    %142 = arith.andi %66, %72 : vector<1x512xi1>
    %cst_22 = arith.constant 0.000000e+00 : f32
    %143 = vector.shape_cast %142 : vector<1x512xi1> to vector<1x512xi1>
    %144 = vector.broadcast %143 : vector<1x512xi1> to vector<4x512xi1>
    %145 = vector.broadcast %cst_22 : f32 to vector<4x512xf32>
    %146 = arith.select %144, %141, %145 : vector<4x512xi1>, vector<4x512xf32>
    %147 = vector.extract_strided_slice %73 {offsets = [0, 8], sizes = [4, 1], strides = [1, 1]} : vector<4x36xf32> to vector<4x1xf32>
    %148 = vector.extract_strided_slice %146 {offsets = [0, 0], sizes = [1, 512], strides = [1, 1]} : vector<4x512xf32> to vector<1x512xf32>
    %149 = vector.broadcast %147 : vector<4x1xf32> to vector<4x512xf32>
    %150 = vector.broadcast %148 : vector<1x512xf32> to vector<4x512xf32>
    %151 = arith.mulf %149, %150 : vector<4x512xf32>
    %152 = arith.addf %138, %151 : vector<4x512xf32>
    %153 = vector.extract_strided_slice %73 {offsets = [0, 9], sizes = [4, 1], strides = [1, 1]} : vector<4x36xf32> to vector<4x1xf32>
    %154 = vector.extract_strided_slice %146 {offsets = [1, 0], sizes = [1, 512], strides = [1, 1]} : vector<4x512xf32> to vector<1x512xf32>
    %155 = vector.broadcast %153 : vector<4x1xf32> to vector<4x512xf32>
    %156 = vector.broadcast %154 : vector<1x512xf32> to vector<4x512xf32>
    %157 = arith.mulf %155, %156 : vector<4x512xf32>
    %158 = arith.addf %152, %157 : vector<4x512xf32>
    %159 = vector.extract_strided_slice %73 {offsets = [0, 10], sizes = [4, 1], strides = [1, 1]} : vector<4x36xf32> to vector<4x1xf32>
    %160 = vector.extract_strided_slice %146 {offsets = [2, 0], sizes = [1, 512], strides = [1, 1]} : vector<4x512xf32> to vector<1x512xf32>
    %161 = vector.broadcast %159 : vector<4x1xf32> to vector<4x512xf32>
    %162 = vector.broadcast %160 : vector<1x512xf32> to vector<4x512xf32>
    %163 = arith.mulf %161, %162 : vector<4x512xf32>
    %164 = arith.addf %158, %163 : vector<4x512xf32>
    %165 = vector.extract_strided_slice %73 {offsets = [0, 11], sizes = [4, 1], strides = [1, 1]} : vector<4x36xf32> to vector<4x1xf32>
    %166 = vector.extract_strided_slice %146 {offsets = [3, 0], sizes = [1, 512], strides = [1, 1]} : vector<4x512xf32> to vector<1x512xf32>
    %167 = vector.broadcast %165 : vector<4x1xf32> to vector<4x512xf32>
    %168 = vector.broadcast %166 : vector<1x512xf32> to vector<4x512xf32>
    %169 = arith.mulf %167, %168 : vector<4x512xf32>
    %170 = arith.addf %164, %169 : vector<4x512xf32>
    %171 = vector.extract_strided_slice %31 {offsets = [0, 511], sizes = [4, 1], strides = [1, 1]} : vector<4x512xf32> to vector<4x1xf32>
    %172 = vector.extract_strided_slice %31 {offsets = [0, 0], sizes = [4, 511], strides = [1, 1]} : vector<4x512xf32> to vector<4x511xf32>
    %173 = tpu.concatenate %171, %172 in 1 : vector<4x1xf32>, vector<4x511xf32> -> vector<4x512xf32>
    %cst_23 = arith.constant 0.000000e+00 : f32
    %174 = vector.shape_cast %70 : vector<1x512xi1> to vector<1x512xi1>
    %175 = vector.broadcast %174 : vector<1x512xi1> to vector<4x512xi1>
    %176 = vector.broadcast %cst_23 : f32 to vector<4x512xf32>
    %177 = arith.select %175, %173, %176 : vector<4x512xi1>, vector<4x512xf32>
    %178 = vector.extract_strided_slice %73 {offsets = [0, 12], sizes = [4, 1], strides = [1, 1]} : vector<4x36xf32> to vector<4x1xf32>
    %179 = vector.extract_strided_slice %177 {offsets = [0, 0], sizes = [1, 512], strides = [1, 1]} : vector<4x512xf32> to vector<1x512xf32>
    %180 = vector.broadcast %178 : vector<4x1xf32> to vector<4x512xf32>
    %181 = vector.broadcast %179 : vector<1x512xf32> to vector<4x512xf32>
    %182 = arith.mulf %180, %181 : vector<4x512xf32>
    %183 = arith.addf %170, %182 : vector<4x512xf32>
    %184 = vector.extract_strided_slice %73 {offsets = [0, 13], sizes = [4, 1], strides = [1, 1]} : vector<4x36xf32> to vector<4x1xf32>
    %185 = vector.extract_strided_slice %177 {offsets = [1, 0], sizes = [1, 512], strides = [1, 1]} : vector<4x512xf32> to vector<1x512xf32>
    %186 = vector.broadcast %184 : vector<4x1xf32> to vector<4x512xf32>
    %187 = vector.broadcast %185 : vector<1x512xf32> to vector<4x512xf32>
    %188 = arith.mulf %186, %187 : vector<4x512xf32>
    %189 = arith.addf %183, %188 : vector<4x512xf32>
    %190 = vector.extract_strided_slice %73 {offsets = [0, 14], sizes = [4, 1], strides = [1, 1]} : vector<4x36xf32> to vector<4x1xf32>
    %191 = vector.extract_strided_slice %177 {offsets = [2, 0], sizes = [1, 512], strides = [1, 1]} : vector<4x512xf32> to vector<1x512xf32>
    %192 = vector.broadcast %190 : vector<4x1xf32> to vector<4x512xf32>
    %193 = vector.broadcast %191 : vector<1x512xf32> to vector<4x512xf32>
    %194 = arith.mulf %192, %193 : vector<4x512xf32>
    %195 = arith.addf %189, %194 : vector<4x512xf32>
    %196 = vector.extract_strided_slice %73 {offsets = [0, 15], sizes = [4, 1], strides = [1, 1]} : vector<4x36xf32> to vector<4x1xf32>
    %197 = vector.extract_strided_slice %177 {offsets = [3, 0], sizes = [1, 512], strides = [1, 1]} : vector<4x512xf32> to vector<1x512xf32>
    %198 = vector.broadcast %196 : vector<4x1xf32> to vector<4x512xf32>
    %199 = vector.broadcast %197 : vector<1x512xf32> to vector<4x512xf32>
    %200 = arith.mulf %198, %199 : vector<4x512xf32>
    %201 = arith.addf %195, %200 : vector<4x512xf32>
    %202 = vector.extract_strided_slice %73 {offsets = [0, 16], sizes = [4, 1], strides = [1, 1]} : vector<4x36xf32> to vector<4x1xf32>
    %203 = vector.extract_strided_slice %31 {offsets = [0, 0], sizes = [1, 512], strides = [1, 1]} : vector<4x512xf32> to vector<1x512xf32>
    %204 = vector.broadcast %202 : vector<4x1xf32> to vector<4x512xf32>
    %205 = vector.broadcast %203 : vector<1x512xf32> to vector<4x512xf32>
    %206 = arith.mulf %204, %205 : vector<4x512xf32>
    %207 = arith.addf %201, %206 : vector<4x512xf32>
    %208 = vector.extract_strided_slice %73 {offsets = [0, 17], sizes = [4, 1], strides = [1, 1]} : vector<4x36xf32> to vector<4x1xf32>
    %209 = vector.extract_strided_slice %31 {offsets = [1, 0], sizes = [1, 512], strides = [1, 1]} : vector<4x512xf32> to vector<1x512xf32>
    %210 = vector.broadcast %208 : vector<4x1xf32> to vector<4x512xf32>
    %211 = vector.broadcast %209 : vector<1x512xf32> to vector<4x512xf32>
    %212 = arith.mulf %210, %211 : vector<4x512xf32>
    %213 = arith.addf %207, %212 : vector<4x512xf32>
    %214 = vector.extract_strided_slice %73 {offsets = [0, 18], sizes = [4, 1], strides = [1, 1]} : vector<4x36xf32> to vector<4x1xf32>
    %215 = vector.extract_strided_slice %31 {offsets = [2, 0], sizes = [1, 512], strides = [1, 1]} : vector<4x512xf32> to vector<1x512xf32>
    %216 = vector.broadcast %214 : vector<4x1xf32> to vector<4x512xf32>
    %217 = vector.broadcast %215 : vector<1x512xf32> to vector<4x512xf32>
    %218 = arith.mulf %216, %217 : vector<4x512xf32>
    %219 = arith.addf %213, %218 : vector<4x512xf32>
    %220 = vector.extract_strided_slice %73 {offsets = [0, 19], sizes = [4, 1], strides = [1, 1]} : vector<4x36xf32> to vector<4x1xf32>
    %221 = vector.extract_strided_slice %31 {offsets = [3, 0], sizes = [1, 512], strides = [1, 1]} : vector<4x512xf32> to vector<1x512xf32>
    %222 = vector.broadcast %220 : vector<4x1xf32> to vector<4x512xf32>
    %223 = vector.broadcast %221 : vector<1x512xf32> to vector<4x512xf32>
    %224 = arith.mulf %222, %223 : vector<4x512xf32>
    %225 = arith.addf %219, %224 : vector<4x512xf32>
    %226 = vector.extract_strided_slice %31 {offsets = [0, 1], sizes = [4, 511], strides = [1, 1]} : vector<4x512xf32> to vector<4x511xf32>
    %227 = vector.extract_strided_slice %31 {offsets = [0, 0], sizes = [4, 1], strides = [1, 1]} : vector<4x512xf32> to vector<4x1xf32>
    %228 = tpu.concatenate %226, %227 in 1 : vector<4x511xf32>, vector<4x1xf32> -> vector<4x512xf32>
    %cst_24 = arith.constant 0.000000e+00 : f32
    %229 = vector.shape_cast %72 : vector<1x512xi1> to vector<1x512xi1>
    %230 = vector.broadcast %229 : vector<1x512xi1> to vector<4x512xi1>
    %231 = vector.broadcast %cst_24 : f32 to vector<4x512xf32>
    %232 = arith.select %230, %228, %231 : vector<4x512xi1>, vector<4x512xf32>
    %233 = vector.extract_strided_slice %73 {offsets = [0, 20], sizes = [4, 1], strides = [1, 1]} : vector<4x36xf32> to vector<4x1xf32>
    %234 = vector.extract_strided_slice %232 {offsets = [0, 0], sizes = [1, 512], strides = [1, 1]} : vector<4x512xf32> to vector<1x512xf32>
    %235 = vector.broadcast %233 : vector<4x1xf32> to vector<4x512xf32>
    %236 = vector.broadcast %234 : vector<1x512xf32> to vector<4x512xf32>
    %237 = arith.mulf %235, %236 : vector<4x512xf32>
    %238 = arith.addf %225, %237 : vector<4x512xf32>
    %239 = vector.extract_strided_slice %73 {offsets = [0, 21], sizes = [4, 1], strides = [1, 1]} : vector<4x36xf32> to vector<4x1xf32>
    %240 = vector.extract_strided_slice %232 {offsets = [1, 0], sizes = [1, 512], strides = [1, 1]} : vector<4x512xf32> to vector<1x512xf32>
    %241 = vector.broadcast %239 : vector<4x1xf32> to vector<4x512xf32>
    %242 = vector.broadcast %240 : vector<1x512xf32> to vector<4x512xf32>
    %243 = arith.mulf %241, %242 : vector<4x512xf32>
    %244 = arith.addf %238, %243 : vector<4x512xf32>
    %245 = vector.extract_strided_slice %73 {offsets = [0, 22], sizes = [4, 1], strides = [1, 1]} : vector<4x36xf32> to vector<4x1xf32>
    %246 = vector.extract_strided_slice %232 {offsets = [2, 0], sizes = [1, 512], strides = [1, 1]} : vector<4x512xf32> to vector<1x512xf32>
    %247 = vector.broadcast %245 : vector<4x1xf32> to vector<4x512xf32>
    %248 = vector.broadcast %246 : vector<1x512xf32> to vector<4x512xf32>
    %249 = arith.mulf %247, %248 : vector<4x512xf32>
    %250 = arith.addf %244, %249 : vector<4x512xf32>
    %251 = vector.extract_strided_slice %73 {offsets = [0, 23], sizes = [4, 1], strides = [1, 1]} : vector<4x36xf32> to vector<4x1xf32>
    %252 = vector.extract_strided_slice %232 {offsets = [3, 0], sizes = [1, 512], strides = [1, 1]} : vector<4x512xf32> to vector<1x512xf32>
    %253 = vector.broadcast %251 : vector<4x1xf32> to vector<4x512xf32>
    %254 = vector.broadcast %252 : vector<1x512xf32> to vector<4x512xf32>
    %255 = arith.mulf %253, %254 : vector<4x512xf32>
    %256 = arith.addf %250, %255 : vector<4x512xf32>
    %257 = vector.extract_strided_slice %31 {offsets = [0, 15], sizes = [4, 497], strides = [1, 1]} : vector<4x512xf32> to vector<4x497xf32>
    %258 = vector.extract_strided_slice %31 {offsets = [0, 0], sizes = [4, 15], strides = [1, 1]} : vector<4x512xf32> to vector<4x15xf32>
    %259 = tpu.concatenate %257, %258 in 1 : vector<4x497xf32>, vector<4x15xf32> -> vector<4x512xf32>
    %260 = arith.andi %68, %70 : vector<1x512xi1>
    %cst_25 = arith.constant 0.000000e+00 : f32
    %261 = vector.shape_cast %260 : vector<1x512xi1> to vector<1x512xi1>
    %262 = vector.broadcast %261 : vector<1x512xi1> to vector<4x512xi1>
    %263 = vector.broadcast %cst_25 : f32 to vector<4x512xf32>
    %264 = arith.select %262, %259, %263 : vector<4x512xi1>, vector<4x512xf32>
    %265 = vector.extract_strided_slice %73 {offsets = [0, 24], sizes = [4, 1], strides = [1, 1]} : vector<4x36xf32> to vector<4x1xf32>
    %266 = vector.extract_strided_slice %264 {offsets = [0, 0], sizes = [1, 512], strides = [1, 1]} : vector<4x512xf32> to vector<1x512xf32>
    %267 = vector.broadcast %265 : vector<4x1xf32> to vector<4x512xf32>
    %268 = vector.broadcast %266 : vector<1x512xf32> to vector<4x512xf32>
    %269 = arith.mulf %267, %268 : vector<4x512xf32>
    %270 = arith.addf %256, %269 : vector<4x512xf32>
    %271 = vector.extract_strided_slice %73 {offsets = [0, 25], sizes = [4, 1], strides = [1, 1]} : vector<4x36xf32> to vector<4x1xf32>
    %272 = vector.extract_strided_slice %264 {offsets = [1, 0], sizes = [1, 512], strides = [1, 1]} : vector<4x512xf32> to vector<1x512xf32>
    %273 = vector.broadcast %271 : vector<4x1xf32> to vector<4x512xf32>
    %274 = vector.broadcast %272 : vector<1x512xf32> to vector<4x512xf32>
    %275 = arith.mulf %273, %274 : vector<4x512xf32>
    %276 = arith.addf %270, %275 : vector<4x512xf32>
    %277 = vector.extract_strided_slice %73 {offsets = [0, 26], sizes = [4, 1], strides = [1, 1]} : vector<4x36xf32> to vector<4x1xf32>
    %278 = vector.extract_strided_slice %264 {offsets = [2, 0], sizes = [1, 512], strides = [1, 1]} : vector<4x512xf32> to vector<1x512xf32>
    %279 = vector.broadcast %277 : vector<4x1xf32> to vector<4x512xf32>
    %280 = vector.broadcast %278 : vector<1x512xf32> to vector<4x512xf32>
    %281 = arith.mulf %279, %280 : vector<4x512xf32>
    %282 = arith.addf %276, %281 : vector<4x512xf32>
    %283 = vector.extract_strided_slice %73 {offsets = [0, 27], sizes = [4, 1], strides = [1, 1]} : vector<4x36xf32> to vector<4x1xf32>
    %284 = vector.extract_strided_slice %264 {offsets = [3, 0], sizes = [1, 512], strides = [1, 1]} : vector<4x512xf32> to vector<1x512xf32>
    %285 = vector.broadcast %283 : vector<4x1xf32> to vector<4x512xf32>
    %286 = vector.broadcast %284 : vector<1x512xf32> to vector<4x512xf32>
    %287 = arith.mulf %285, %286 : vector<4x512xf32>
    %288 = arith.addf %282, %287 : vector<4x512xf32>
    %289 = vector.extract_strided_slice %31 {offsets = [0, 16], sizes = [4, 496], strides = [1, 1]} : vector<4x512xf32> to vector<4x496xf32>
    %290 = vector.extract_strided_slice %31 {offsets = [0, 0], sizes = [4, 16], strides = [1, 1]} : vector<4x512xf32> to vector<4x16xf32>
    %291 = tpu.concatenate %289, %290 in 1 : vector<4x496xf32>, vector<4x16xf32> -> vector<4x512xf32>
    %cst_26 = arith.constant 0.000000e+00 : f32
    %292 = vector.shape_cast %68 : vector<1x512xi1> to vector<1x512xi1>
    %293 = vector.broadcast %292 : vector<1x512xi1> to vector<4x512xi1>
    %294 = vector.broadcast %cst_26 : f32 to vector<4x512xf32>
    %295 = arith.select %293, %291, %294 : vector<4x512xi1>, vector<4x512xf32>
    %296 = vector.extract_strided_slice %73 {offsets = [0, 28], sizes = [4, 1], strides = [1, 1]} : vector<4x36xf32> to vector<4x1xf32>
    %297 = vector.extract_strided_slice %295 {offsets = [0, 0], sizes = [1, 512], strides = [1, 1]} : vector<4x512xf32> to vector<1x512xf32>
    %298 = vector.broadcast %296 : vector<4x1xf32> to vector<4x512xf32>
    %299 = vector.broadcast %297 : vector<1x512xf32> to vector<4x512xf32>
    %300 = arith.mulf %298, %299 : vector<4x512xf32>
    %301 = arith.addf %288, %300 : vector<4x512xf32>
    %302 = vector.extract_strided_slice %73 {offsets = [0, 29], sizes = [4, 1], strides = [1, 1]} : vector<4x36xf32> to vector<4x1xf32>
    %303 = vector.extract_strided_slice %295 {offsets = [1, 0], sizes = [1, 512], strides = [1, 1]} : vector<4x512xf32> to vector<1x512xf32>
    %304 = vector.broadcast %302 : vector<4x1xf32> to vector<4x512xf32>
    %305 = vector.broadcast %303 : vector<1x512xf32> to vector<4x512xf32>
    %306 = arith.mulf %304, %305 : vector<4x512xf32>
    %307 = arith.addf %301, %306 : vector<4x512xf32>
    %308 = vector.extract_strided_slice %73 {offsets = [0, 30], sizes = [4, 1], strides = [1, 1]} : vector<4x36xf32> to vector<4x1xf32>
    %309 = vector.extract_strided_slice %295 {offsets = [2, 0], sizes = [1, 512], strides = [1, 1]} : vector<4x512xf32> to vector<1x512xf32>
    %310 = vector.broadcast %308 : vector<4x1xf32> to vector<4x512xf32>
    %311 = vector.broadcast %309 : vector<1x512xf32> to vector<4x512xf32>
    %312 = arith.mulf %310, %311 : vector<4x512xf32>
    %313 = arith.addf %307, %312 : vector<4x512xf32>
    %314 = vector.extract_strided_slice %73 {offsets = [0, 31], sizes = [4, 1], strides = [1, 1]} : vector<4x36xf32> to vector<4x1xf32>
    %315 = vector.extract_strided_slice %295 {offsets = [3, 0], sizes = [1, 512], strides = [1, 1]} : vector<4x512xf32> to vector<1x512xf32>
    %316 = vector.broadcast %314 : vector<4x1xf32> to vector<4x512xf32>
    %317 = vector.broadcast %315 : vector<1x512xf32> to vector<4x512xf32>
    %318 = arith.mulf %316, %317 : vector<4x512xf32>
    %319 = arith.addf %313, %318 : vector<4x512xf32>
    %320 = vector.extract_strided_slice %31 {offsets = [0, 17], sizes = [4, 495], strides = [1, 1]} : vector<4x512xf32> to vector<4x495xf32>
    %321 = vector.extract_strided_slice %31 {offsets = [0, 0], sizes = [4, 17], strides = [1, 1]} : vector<4x512xf32> to vector<4x17xf32>
    %322 = tpu.concatenate %320, %321 in 1 : vector<4x495xf32>, vector<4x17xf32> -> vector<4x512xf32>
    %323 = arith.andi %68, %72 : vector<1x512xi1>
    %cst_27 = arith.constant 0.000000e+00 : f32
    %324 = vector.shape_cast %323 : vector<1x512xi1> to vector<1x512xi1>
    %325 = vector.broadcast %324 : vector<1x512xi1> to vector<4x512xi1>
    %326 = vector.broadcast %cst_27 : f32 to vector<4x512xf32>
    %327 = arith.select %325, %322, %326 : vector<4x512xi1>, vector<4x512xf32>
    %328 = vector.extract_strided_slice %73 {offsets = [0, 32], sizes = [4, 1], strides = [1, 1]} : vector<4x36xf32> to vector<4x1xf32>
    %329 = vector.extract_strided_slice %327 {offsets = [0, 0], sizes = [1, 512], strides = [1, 1]} : vector<4x512xf32> to vector<1x512xf32>
    %330 = vector.broadcast %328 : vector<4x1xf32> to vector<4x512xf32>
    %331 = vector.broadcast %329 : vector<1x512xf32> to vector<4x512xf32>
    %332 = arith.mulf %330, %331 : vector<4x512xf32>
    %333 = arith.addf %319, %332 : vector<4x512xf32>
    %334 = vector.extract_strided_slice %73 {offsets = [0, 33], sizes = [4, 1], strides = [1, 1]} : vector<4x36xf32> to vector<4x1xf32>
    %335 = vector.extract_strided_slice %327 {offsets = [1, 0], sizes = [1, 512], strides = [1, 1]} : vector<4x512xf32> to vector<1x512xf32>
    %336 = vector.broadcast %334 : vector<4x1xf32> to vector<4x512xf32>
    %337 = vector.broadcast %335 : vector<1x512xf32> to vector<4x512xf32>
    %338 = arith.mulf %336, %337 : vector<4x512xf32>
    %339 = arith.addf %333, %338 : vector<4x512xf32>
    %340 = vector.extract_strided_slice %73 {offsets = [0, 34], sizes = [4, 1], strides = [1, 1]} : vector<4x36xf32> to vector<4x1xf32>
    %341 = vector.extract_strided_slice %327 {offsets = [2, 0], sizes = [1, 512], strides = [1, 1]} : vector<4x512xf32> to vector<1x512xf32>
    %342 = vector.broadcast %340 : vector<4x1xf32> to vector<4x512xf32>
    %343 = vector.broadcast %341 : vector<1x512xf32> to vector<4x512xf32>
    %344 = arith.mulf %342, %343 : vector<4x512xf32>
    %345 = arith.addf %339, %344 : vector<4x512xf32>
    %346 = vector.extract_strided_slice %73 {offsets = [0, 35], sizes = [4, 1], strides = [1, 1]} : vector<4x36xf32> to vector<4x1xf32>
    %347 = vector.extract_strided_slice %327 {offsets = [3, 0], sizes = [1, 512], strides = [1, 1]} : vector<4x512xf32> to vector<1x512xf32>
    %348 = vector.broadcast %346 : vector<4x1xf32> to vector<4x512xf32>
    %349 = vector.broadcast %347 : vector<1x512xf32> to vector<4x512xf32>
    %350 = arith.mulf %348, %349 : vector<4x512xf32>
    %351 = arith.addf %345, %350 : vector<4x512xf32>
    %cst_28 = arith.constant 0.000000e+00 : f32
    %cst_29 = arith.constant 1.000000e+00 : f32
    %352 = vector.broadcast %cst_28 : f32 to vector<4x512xf32>
    %353 = arith.maximumf %352, %351 : vector<4x512xf32>
    %354 = vector.broadcast %cst_29 : f32 to vector<4x512xf32>
    %355 = arith.minimumf %354, %353 : vector<4x512xf32>
    %c0_30 = arith.constant 0 : index
    %c0_31 = arith.constant 0 : index
    %356 = vector.load %arg6[%c0_30, %c0_31] : memref<8x4xf32, #tpu.memory_space<vmem>>, vector<8x4xf32>
    %357 = vector.extract_strided_slice %356 {offsets = [0, 0], sizes = [8, 1], strides = [1, 1]} : vector<8x4xf32> to vector<8x1xf32>
    %358 = vector.extract_strided_slice %355 {offsets = [0, 0], sizes = [1, 512], strides = [1, 1]} : vector<4x512xf32> to vector<1x512xf32>
    %359 = vector.broadcast %357 : vector<8x1xf32> to vector<8x512xf32>
    %360 = vector.broadcast %358 : vector<1x512xf32> to vector<8x512xf32>
    %361 = arith.mulf %359, %360 : vector<8x512xf32>
    %c0_32 = arith.constant 0 : index
    %c0_33 = arith.constant 0 : index
    %362 = vector.load %arg7[%c0_32, %c0_33] : memref<8x1xf32, #tpu.memory_space<vmem>>, vector<8x1xf32>
    %363 = vector.broadcast %362 : vector<8x1xf32> to vector<8x512xf32>
    %364 = arith.addf %361, %363 : vector<8x512xf32>
    %365 = vector.extract_strided_slice %356 {offsets = [0, 1], sizes = [8, 1], strides = [1, 1]} : vector<8x4xf32> to vector<8x1xf32>
    %366 = vector.extract_strided_slice %355 {offsets = [1, 0], sizes = [1, 512], strides = [1, 1]} : vector<4x512xf32> to vector<1x512xf32>
    %367 = vector.broadcast %365 : vector<8x1xf32> to vector<8x512xf32>
    %368 = vector.broadcast %366 : vector<1x512xf32> to vector<8x512xf32>
    %369 = arith.mulf %367, %368 : vector<8x512xf32>
    %370 = arith.addf %364, %369 : vector<8x512xf32>
    %371 = vector.extract_strided_slice %356 {offsets = [0, 2], sizes = [8, 1], strides = [1, 1]} : vector<8x4xf32> to vector<8x1xf32>
    %372 = vector.extract_strided_slice %355 {offsets = [2, 0], sizes = [1, 512], strides = [1, 1]} : vector<4x512xf32> to vector<1x512xf32>
    %373 = vector.broadcast %371 : vector<8x1xf32> to vector<8x512xf32>
    %374 = vector.broadcast %372 : vector<1x512xf32> to vector<8x512xf32>
    %375 = arith.mulf %373, %374 : vector<8x512xf32>
    %376 = arith.addf %370, %375 : vector<8x512xf32>
    %377 = vector.extract_strided_slice %356 {offsets = [0, 3], sizes = [8, 1], strides = [1, 1]} : vector<8x4xf32> to vector<8x1xf32>
    %378 = vector.extract_strided_slice %355 {offsets = [3, 0], sizes = [1, 512], strides = [1, 1]} : vector<4x512xf32> to vector<1x512xf32>
    %379 = vector.broadcast %377 : vector<8x1xf32> to vector<8x512xf32>
    %380 = vector.broadcast %378 : vector<1x512xf32> to vector<8x512xf32>
    %381 = arith.mulf %379, %380 : vector<8x512xf32>
    %382 = arith.addf %376, %381 : vector<8x512xf32>
    %c0_34 = arith.constant 0 : index
    %c0_35 = arith.constant 0 : index
    %383 = vector.load %arg8[%c0_34, %c0_35] : memref<8x512xf32, #tpu.memory_space<vmem>>, vector<8x512xf32>
    tpu.vector_store %arg8[%c0_34, %c0_35], %382 {strides = array<i32>} : memref<8x512xf32, #tpu.memory_space<vmem>>, vector<8x512xf32>,
    return
  }
  func.func @transform_0(%arg0: i32) -> (i32, i32) {
    %c0_i32 = arith.constant 0 : i32
    %c0_i32_0 = arith.constant 0 : i32
    return %c0_i32, %arg0 : i32, i32
  }
  func.func @transform_1(%arg0: i32) -> (i32, i32) {
    %c0_i32 = arith.constant 0 : i32
    %c0_i32_0 = arith.constant 0 : i32
    %c0_i32_1 = arith.constant 0 : i32
    return %c0_i32, %c0_i32_0 : i32, i32
  }
  func.func @transform_2(%arg0: i32) -> (i32, i32) {
    %c0_i32 = arith.constant 0 : i32
    %c0_i32_0 = arith.constant 0 : i32
    %c0_i32_1 = arith.constant 0 : i32
    return %c0_i32, %c0_i32_0 : i32, i32
  }
  func.func @transform_3(%arg0: i32) -> (i32, i32) {
    %c0_i32 = arith.constant 0 : i32
    %c0_i32_0 = arith.constant 0 : i32
    %c0_i32_1 = arith.constant 0 : i32
    return %c0_i32, %c0_i32_0 : i32, i32
  }
  func.func @transform_4(%arg0: i32) -> (i32, i32) {
    %c0_i32 = arith.constant 0 : i32
    %c0_i32_0 = arith.constant 0 : i32
    %c0_i32_1 = arith.constant 0 : i32
    return %c0_i32, %c0_i32_0 : i32, i32
  }
  func.func @transform_5(%arg0: i32) -> (i32, i32) {
    %c0_i32 = arith.constant 0 : i32
    %c0_i32_0 = arith.constant 0 : i32
    %c0_i32_1 = arith.constant 0 : i32
    return %c0_i32, %c0_i32_0 : i32, i32
  }
  func.func @transform_6(%arg0: i32) -> (i32, i32) {
    %c0_i32 = arith.constant 0 : i32
    %c0_i32_0 = arith.constant 0 : i32
    %c0_i32_1 = arith.constant 0 : i32
    return %c0_i32, %c0_i32_0 : i32, i32
  }
  func.func @transform_7(%arg0: i32) -> (i32, i32) {
    %c0_i32 = arith.constant 0 : i32
    %c0_i32_0 = arith.constant 0 : i32
    return %c0_i32, %arg0 : i32, i32
  }
}

</mosaic_0001>

<bundles_post_ra>
// kernel: quant_residual131_forward.1
= control target key start
LH: loop header
LB: loop body
LE: loop exit
PB: predicated region body
PF: predicated region fallthrough
CT: control target
= control target key end

     0   :  { %v1857_v0 = vmov 3   ;;  %v1858_v1 = vmov 1   ;;  %v1859_v3 = vmov 0   ;;  %v1860_v4 = vmov 2   ;;  %s1888_s9 = smov 16   ;;  %s1889_s10 = smov 15   ;;  %s2797_s1 = inlined_call_operand.vmem [shape: f32[4,4], index: 1, kind: input, shape index: {}]   ;;  %s2798_s2 = inlined_call_operand.vmem [shape: f32[4,1], index: 2, kind: input, shape index: {}]   ;;  %s2799_s4 = inlined_call_operand.vmem [shape: f32[4,1], index: 4, kind: input, shape index: {}]   ;;  %s2800_s3 = inlined_call_operand.vmem [shape: f32[4,36], index: 3, kind: input, shape index: {}]   ;;  %s2801_s0 = inlined_call_operand.vmem [shape: f32[4,512], index: 0, kind: input, shape index: {}]   ;;  %s2802_s5 = inlined_call_operand.vmem [shape: f32[8,4], index: 5, kind: input, shape index: {}]   ;;  %s2803_s6 = inlined_call_operand.vmem [shape: f32[8,1], index: 6, kind: input, shape index: {}]   ;;  %s2804_s7 = inlined_call_operand.vmem [shape: f32[8,512], index: 7, kind: output, shape index: {}]  }
   0x1   :  { %1813 = vset.pattern.permute.xlu0 %v1857_v0  ;;  %1811 = vset.pattern.permute.xlu1 %v1858_v1  ;;  %v28_v2 = vld [vmem:[%s2797_s1] sm:$0xf]  ;;  %v1861_v8 = vmov 5   ;;  %v1862_v9 = vmov 4   ;;  %v1863_v10 = vmov 8   ;;  %v1864_v11 = vmov 6  }
   0x2   :  { %183 = vperm.xlu0 %1813, %v28_v2   ;;  %87 = vperm.xlu1 %1811, %v28_v2   ;;  %v76_v5 = vld [vmem:[%s2798_s2] sm:$0xf]  ;;  %v1865_v12 = vmov 11   ;;  %v1866_v13 = vmov 7   ;;  %v1867_v14 = vmov 12   ;;  %v1868_v15 = vmov 9  }
   0x3   :  { %v356_v6 = vld [vmem:[%s2799_s4] sm:$0xf]  ;;  %v1869_v16 = vmov 15   ;;  %v1870_v17 = vmov 10   ;;  %v1871_v18 = vmov 18   ;;  %v1872_v19 = vmov 13  }
   0x4   :  { %v1958_v7 = vld [vmem:[%s2800_s3] sm:$0xf]  ;;  %v1873_v20 = vmov 21   ;;  %v1874_v21 = vmov 14   ;;  %v1875_v22 = vmov 24   ;;  %v1876_v23 = vmov 16  }
   0x5   :  { %v1877_v24 = vmov 25   ;;  %v1878_v25 = vmov 17   ;;  %v1879_v26 = vmov 28   ;;  %v1880_v27 = vmov 19   ;;  %v26_v44 = vld [vmem:[%s2801_s0] sm:$0xff]  ;;  %v27_v45 = vld [vmem:[%s2801_s0 + $0x8] sm:$0xff] }
   0x6   :  { %1814 = vset.pattern.permute.xlu0 %v1859_v3  ;;  %1812 = vset.pattern.permute.xlu1 %v1860_v4  ;;  %v1881_v28 = vmov 20   ;;  %v1882_v29 = vmov 22   ;;  %v1883_v30 = vmov 23   ;;  %v1884_v31 = vmov 26   ;;  %s1887_s0 = smov 17   ;;  %s1890_s11 = smov 1  }
   0x7   :  { %31 = vperm.xlu0 %1814, %v28_v2   ;;  %135 = vperm.xlu1 %1812, %v28_v2   ;;  %v1885_v32 = vmov 27   ;;  %v1886_v33 = vmov 30   ;;  %v36_v34 = vlaneseq  ;;  %s1891_s12 = smov 127   ;;  %s1892_s13 = smov 113   ;;  %vm370_vm3 = vcmask 138240  }
   0x8   :  { %s1893_s14 = smov 112   ;;  %s1896_s15 = smov 111   ;;  %vm522_vm8 = vcmask 130048   ;;  %vm664_vm11 = vcmask 121856   ;;  %vm1063_vm14 = vcmask 1039360  }
   0x9   :  { %v37_v35 = vshrl.u32 %v36_v34, 7 }
   0xb   :  { %79 = vperm.xlu0 %1814, %v76_v5   ;;  %1815 = vset.pattern.permute.xlu1 %v1859_v3  ;;  %v1992_v36 = vsub.s32 1, %v37_v35  ;;  %v96_v37 = vsub.s32 5, %v37_v35  ;;  %v1994_v38 = vsub.s32 0, %v37_v35  ;;  %v42_v39 = vsub.s32 4, %v37_v35 }
   0xc   :  { %422 = vperm.xlu1 %1815, %v356_v6   ;;  %v1996_v40 = vsub.s32 2, %v37_v35  ;;  %v144_v41 = vsub.s32 6, %v37_v35  ;;  %v1998_v42 = vsub.s32 3, %v37_v35  ;;  %v192_v43 = vsub.s32 7, %v37_v35 }
   0xd   :  { %v93_v46 = vrot.slane %v26_v44, %v1992_v36  ;;  %v97_v47 = vrot.slane %v26_v44, %v96_v37  ;;  %v101_v48 = vrot.slane %v27_v45, %v1992_v36  ;;  %v39_v50 = vrot.slane %v26_v44, %v1994_v38 }
   0xe   :  { %v43_v51 = vrot.slane %v26_v44, %v42_v39  ;;  %v47_v52 = vrot.slane %v27_v45, %v1994_v38  ;;  %v51_v53 = vrot.slane %v27_v45, %v42_v39  ;;  %v105_v55 = vrot.slane %v27_v45, %v96_v37 }
   0xf   :  { %397 = vperm.xlu0 %1814, %v1958_v7   ;;  %v141_v56 = vrot.slane %v26_v44, %v1996_v40  ;;  %v145_v57 = vrot.slane %v26_v44, %v144_v41  ;;  %v153_v58 = vrot.slane %v27_v45, %v144_v41  ;;  %v189_v59 = vrot.slane %v26_v44, %v1998_v42 }
  0x10   :  { %1816 = vset.pattern.permute.xlu1 %v1858_v1  ;;  %v193_v60 = vrot.slane %v26_v44, %v192_v43  ;;  %v201_v61 = vrot.slane %v27_v45, %v192_v43  ;;  %v113_v62 = vrot.slane %v93_v46, %v1992_v36  ;;  %v117_v63 = vrot.slane %v97_v47, %v1992_v36 }
  0x11   :  { %430 = vperm.xlu1 %1816, %v1958_v7   ;;  %v121_v2 = vrot.slane %v101_v48, %v1992_v36  ;;  %v149_v5 = vrot.slane %v27_v45, %v1996_v40  ;;  %v59_v6 = vrot.slane %v39_v50, %v1994_v38 }
  0x13   :  { %1817 = vset.pattern.permute.xlu0 %v1860_v4 }
  0x14   :  { %458 = vperm.xlu0 %1817, %v1958_v7  }
  0x15   :  { %1818 = vset.pattern.permute.xlu1 %v1857_v0 }
  0x16   :  { %486 = vperm.xlu1 %1818, %v1958_v7  }
  0x18   :  { %1820 = vset.pattern.permute.xlu0 %v1861_v8  ;;  %v63_v8 = vrot.slane %v43_v51, %v1994_v38 }
  0x19   :  { %572 = vperm.xlu0 %1820, %v1958_v7  }
  0x1a   :  { %1819 = vset.pattern.permute.xlu1 %v1862_v9  ;;  %v67_v9 = vrot.slane %v47_v52, %v1994_v38 }
  0x1b   :  { %544 = vperm.xlu1 %1819, %v1958_v7  }
  0x1d   :  { %1823 = vset.pattern.permute.xlu0 %v1863_v10  ;;  %v71_v10 = vrot.slane %v51_v53, %v1994_v38 }
  0x1e   :  { %690 = vperm.xlu0 %1823, %v1958_v7  }
  0x1f   :  { %1821 = vset.pattern.permute.xlu1 %v1864_v11 }
  0x20   :  { %600 = vperm.xlu1 %1821, %v1958_v7  }
  0x22   :  { %1826 = vset.pattern.permute.xlu0 %v1865_v12  ;;  %v125_v12 = vrot.slane %v105_v55, %v1992_v36 }
  0x23   :  { %774 = vperm.xlu0 %1826, %v1958_v7  }
  0x24   :  { %1822 = vset.pattern.permute.xlu1 %v1866_v13  ;;  %v161_v13 = vrot.slane %v141_v56, %v1996_v40 }
  0x25   :  { %628 = vperm.xlu1 %1822, %v1958_v7  }
  0x27   :  { %1827 = vset.pattern.permute.xlu0 %v1867_v14  ;;  %v165_v14 = vrot.slane %v145_v57, %v1996_v40 }
  0x28   :  { %832 = vperm.xlu0 %1827, %v1958_v7  }
  0x29   :  { %1824 = vset.pattern.permute.xlu1 %v1868_v15  ;;  %v173_v15 = vrot.slane %v153_v58, %v1996_v40 }
  0x2a   :  { %718 = vperm.xlu1 %1824, %v1958_v7  }
  0x2c   :  { %1830 = vset.pattern.permute.xlu0 %v1869_v16  ;;  %v197_v16 = vrot.slane %v27_v45, %v1998_v42 }
  0x2d   :  { %916 = vperm.xlu0 %1830, %v1958_v7  }
  0x2e   :  { %1825 = vset.pattern.permute.xlu1 %v1870_v17  ;;  %v209_v17 = vrot.slane %v189_v59, %v1998_v42  ;;  %v217_v50 = vrot.slane %v197_v16, %v1998_v42 }
  0x2f   :  { %746 = vperm.xlu1 %1825, %v1958_v7  }
  0x31   :  { %1833 = vset.pattern.permute.xlu0 %v1871_v18  ;;  %v213_v18 = vrot.slane %v193_v60, %v1998_v42 }
  0x32   :  { %1000 = vperm.xlu0 %1833, %v1958_v7  }
  0x33   :  { %1828 = vset.pattern.permute.xlu1 %v1872_v19  ;;  %v221_v19 = vrot.slane %v201_v61, %v1998_v42 }
  0x34   :  { %860 = vperm.xlu1 %1828, %v1958_v7  }
  0x36   :  { %1836 = vset.pattern.permute.xlu0 %v1873_v20 }
  0x37   :  { %1114 = vperm.xlu0 %1836, %v1958_v7  }
  0x38   :  { %1829 = vset.pattern.permute.xlu1 %v1874_v21 }
  0x39   :  { %888 = vperm.xlu1 %1829, %v1958_v7  }
  0x3b   :  { %1839 = vset.pattern.permute.xlu0 %v1875_v22 }
  0x3c   :  { %1232 = vperm.xlu0 %1839, %v1958_v7  }
  0x3d   :  { %1831 = vset.pattern.permute.xlu1 %v1876_v23 }
  0x3e   :  { %944 = vperm.xlu1 %1831, %v1958_v7  }
  0x40   :  { %1840 = vset.pattern.permute.xlu0 %v1877_v24  ;;  %v169_v24 = vrot.slane %v149_v5, %v1996_v40 }
  0x41   :  { %1260 = vperm.xlu0 %1840, %v1958_v7  }
  0x42   :  { %1832 = vset.pattern.permute.xlu1 %v1878_v25 }
  0x43   :  { %972 = vperm.xlu1 %1832, %v1958_v7  }
  0x45   :  { %1843 = vset.pattern.permute.xlu0 %v1879_v26 }
  0x47   :  { %1834 = vset.pattern.permute.xlu1 %v1880_v27 }
  0x48   :  { %1028 = vperm.xlu1 %1834, %v1958_v7  }
  0x4c   :  { %1835 = vset.pattern.permute.xlu1 %v1881_v28 }
  0x4d   :  { %1086 = vperm.xlu1 %1835, %v1958_v7  }
  0x51   :  { %1837 = vset.pattern.permute.xlu1 %v1882_v29 }
  0x52   :  { %1142 = vperm.xlu1 %1837, %v1958_v7  }
  0x56   :  { %1838 = vset.pattern.permute.xlu1 %v1883_v30 }
  0x57   :  { %1170 = vperm.xlu1 %1838, %v1958_v7  }
  0x5b   :  { %1841 = vset.pattern.permute.xlu1 %v1884_v31 }
  0x5c   :  { %1288 = vperm.xlu1 %1841, %v1958_v7  }
  0x60   :  { %1842 = vset.pattern.permute.xlu1 %v1885_v32 }
  0x61   :  { %1316 = vperm.xlu1 %1842, %v1958_v7  }
  0x65   :  { %1845 = vset.pattern.permute.xlu1 %v1886_v33 }
  0x7d   :  { %v2008_v49 = vpop.permute.xlu0 %183  ;;  %v88_v54 = vpop.permute.xlu1 %87 }
  0x7e   :  { %v126_v21 = vmul.f32 %v113_v62, %v88_v54  ;;  %v127_v22 = vmul.f32 %v117_v63, %v88_v54  ;;  %v128_v23 = vmul.f32 %v121_v2, %v88_v54  ;;  %v129_v29 = vmul.f32 %v125_v12, %v88_v54 }
  0x7f   :  { %v222_v51 = vmul.f32 %v209_v17, %v2008_v49  ;;  %v223_v52 = vmul.f32 %v213_v18, %v2008_v49  ;;  %v225_v53 = vmul.f32 %v221_v19, %v2008_v49  ;;  %v224_v62 = vmul.f32 %v217_v50, %v2008_v49 }
  0x82   :  { %v32_v11 = vpop.permute.xlu0 %31  ;;  %v136_v20 = vpop.permute.xlu1 %135 }
  0x83   :  { %v72_v25 = vmul.f32 %v59_v6, %v32_v11  ;;  %v73_v26 = vmul.f32 %v63_v8, %v32_v11  ;;  %v74_v27 = vmul.f32 %v67_v9, %v32_v11  ;;  %v75_v28 = vmul.f32 %v71_v10, %v32_v11 }
  0x84   :  { %v174_v31 = vmul.f32 %v161_v13, %v136_v20  ;;  %v175_v32 = vmul.f32 %v165_v14, %v136_v20  ;;  %v177_v33 = vmul.f32 %v173_v15, %v136_v20  ;;  %v176_v44 = vmul.f32 %v169_v24, %v136_v20 }
  0x86   :  { %v80_v30 = vpop.permute.xlu0 %79 }
  0x87   :  { %v82_v35 = vadd.f32 %v80_v30, %v72_v25  ;;  %v83_v37 = vadd.f32 %v80_v30, %v73_v26  ;;  %v84_v39 = vadd.f32 %v80_v30, %v74_v27  ;;  %v85_v41 = vadd.f32 %v80_v30, %v75_v28  ;;  %v2031_v43 = vpop.permute.xlu1 %422 }
  0x89   :  { %v130_v45 = vadd.f32 %v126_v21, %v82_v35  ;;  %v131_v46 = vadd.f32 %v127_v22, %v83_v37  ;;  %v132_v47 = vadd.f32 %v128_v23, %v84_v39  ;;  %v133_v48 = vadd.f32 %v129_v29, %v85_v41  ;;  %v2128_v35 = vld [vmem:[%s2802_s5] sm:$0xff] }
  0x8a   :  { %v1894_v23 = vmov 29   ;;  %v1895_v29 = vmov 32  }
  0x8b   :  { %v178_v54 = vadd.f32 %v174_v31, %v130_v45  ;;  %v179_v55 = vadd.f32 %v175_v32, %v131_v46  ;;  %v181_v56 = vadd.f32 %v177_v33, %v133_v48  ;;  %v180_v58 = vadd.f32 %v176_v44, %v132_v47  ;;  %v2114_v31 = vpop.permute.xlu0 %397 }
  0x8c   :  { %v2037_v57 = vpop.permute.xlu1 %430  ;;  %v1897_v32 = vmov 33   ;;  %v1898_v44 = vmov 31  }
  0x8d   :  { %v226_v59 = vadd.f32 %v222_v51, %v178_v54  ;;  %v227_v60 = vadd.f32 %v223_v52, %v179_v55  ;;  %v229_v61 = vadd.f32 %v225_v53, %v181_v56  ;;  %v228_v5 = vadd.f32 %v224_v62, %v180_v58  ;;  %v1665_v56 = vld [vmem:[%s2803_s6] sm:$0xff] }
  0x8e   :  { %v239_v53 = vand.u32 127, %v36_v34  ;;  %v1900_v54 = vmov 35  }
  0x8f   :  { %v231_v63 = vmax.f32 %v227_v60, 0.0  ;;  %v233_v2 = vmax.f32 %v229_v61, 0.0  ;;  %v230_v6 = vmax.f32 %v226_v59, 0.0  ;;  %v232_v11 = vmax.f32 %v228_v5, 0.0  ;;  %v2120_v33 = vpop.permute.xlu0 %458 }
  0x90   :  { %v2170_v55 = vadd.s32 128, %v239_v53  ;;  %v241_v58 = vadd.s32 256, %v239_v53  ;;  %v247_v61 = vand.u32 255, %v239_v53  ;;  %v2181_v62 = vadd.s32 384, %v239_v53 }
  0x91   :  { %v2040_v8 = vmin.f32 %v231_v63, 1.0  ;;  %v2042_v9 = vmin.f32 %v233_v2, 1.0  ;;  %v2044_v10 = vpop.permute.xlu1 %486  ;;  %v2048_v12 = vmin.f32 %v230_v6, 1.0  ;;  %v2054_v49 = vmin.f32 %v232_v11, 1.0 }
  0x92   :  { %v2806_v34 = vand.u32 255, %v2170_v55  ;;  %2817 = vst [vmem:[#allocation7_spill] sm:$0xff] %v2181_v62  ;;  %v2188_v5 = vand.u32 15, %v247_v61  ;;  %vm2198_vm0 = vcmp.ge.s32.totalorder %v247_v61, 16 }
  0x93   :  { %358 = vrot.lane.b32.xlu1 %v2042_v9, %s1887_s0  ;;  %366 = vrot.lane.b32.xlu0 %v2040_v8, %s1887_s0  ;;  %v958_v20 = vrot.slane %v2054_v49, %v1994_v38  ;;  %v986_v24 = vrot.slane %v2054_v49, %v1992_v36  ;;  %v1042_v27 = vrot.slane %v2054_v49, %v1998_v42 }
  0x94   :  { %v2132_v37 = vpop.permute.xlu0 %572  ;;  %v2192_v6 = vand.u32 15, %v2806_v34  ;;  %vm347_vm1 = vcmp.ge.s32.totalorder %v2188_v5, 1  ;;  %v954_v53 = vrot.slane %v2040_v8, %v1994_v38  ;;  %v1038_v61 = vrot.slane %v2040_v8, %v1998_v42 }
  0x95   :  { %vm379_vm6 = vmand %vm2198_vm0, %vm347_vm1  ;;  %vm351_vm10 = vcmp.lt.s32.totalorder %v2188_v5, 15 }
  0x96   :  { %v2050_v13 = vpop.permute.xlu1 %544  ;;  %vm348_vm2 = vcmp.ge.s32.totalorder %v2192_v6, 1  ;;  %vm352_vm12 = vcmp.lt.s32.totalorder %v2192_v6, 15 }
  0x97   :  { %516 = vrot.lane.b32.xlu0 %v2048_v12, %s1888_s9  ;;  %364 = vrot.lane.b32.xlu1 %v2048_v12, %s1887_s0 }
  0x99   :  { %v2139_v39 = vpop.permute.xlu0 %690 }
  0x9b   :  { %520 = vrot.lane.b32.xlu0 %v2054_v49, %s1888_s9  ;;  %368 = vrot.lane.b32.xlu1 %v2054_v49, %s1887_s0  ;;  %v2058_v14 = vpop.permute.xlu1 %600 }
  0x9e   :  { %v2146_v41 = vpop.permute.xlu0 %774 }
  0x9f   :  { %655 = vrot.lane.b32.xlu0 %v2042_v9, %s1889_s10  ;;  %513 = vrot.lane.b32.xlu1 %v2042_v9, %s1888_s9 }
  0xa0   :  { %v2062_v15 = vpop.permute.xlu1 %628 }
  0xa3   :  { %660 = vrot.lane.b32.xlu0 %v2040_v8, %s1889_s10  ;;  %518 = vrot.lane.b32.xlu1 %v2040_v8, %s1888_s9  ;;  %v2149_v45 = vpop.permute.xlu0 %832 }
  0xa5   :  { %v2066_v16 = vpop.permute.xlu1 %718 }
  0xa7   :  { %806 = vrot.lane.b32.xlu0 %v2040_v8, %s1890_s11  ;;  %658 = vrot.lane.b32.xlu1 %v2048_v12, %s1889_s10 }
  0xa8   :  { %v2155_v47 = vpop.permute.xlu0 %916 }
  0xaa   :  { %v2070_v17 = vpop.permute.xlu1 %746 }
  0xab   :  { %1057 = vrot.lane.b32.xlu0 %v2040_v8, %s1891_s12  ;;  %662 = vrot.lane.b32.xlu1 %v2054_v49, %s1889_s10 }
  0xad   :  { %v1001_v50 = vpop.permute.xlu0 %1000 }
  0xaf   :  { %1059 = vrot.lane.b32.xlu0 %v2054_v49, %s1891_s12  ;;  %801 = vrot.lane.b32.xlu1 %v2042_v9, %s1890_s11  ;;  %v2076_v18 = vpop.permute.xlu1 %860 }
  0xb2   :  { %v2164_v51 = vpop.permute.xlu0 %1114 }
  0xb3   :  { %1201 = vrot.lane.b32.xlu0 %v2054_v49, %s1892_s13  ;;  %804 = vrot.lane.b32.xlu1 %v2048_v12, %s1890_s11 }
  0xb4   :  { %v2081_v19 = vpop.permute.xlu1 %888 }
  0xb7   :  { %1374 = vperm.xlu0 %1843, %v1958_v7   ;;  %808 = vrot.lane.b32.xlu1 %v2054_v49, %s1890_s11  ;;  %v2175_v59 = vpop.permute.xlu0 %1232 }
  0xb8   :  { %2815 = vst [vmem:[#allocation5_spill] sm:$0xff] %v2175_v59 }
  0xb9   :  { %v2087_v21 = vpop.permute.xlu1 %944 }
  0xba   :  { %v2090_v22 = vmul.f32 %v958_v20, %v2087_v21 }
  0xbb   :  { %1347 = vrot.lane.b32.xlu0 %v2054_v49, %s1893_s14  ;;  %1055 = vrot.lane.b32.xlu1 %v2048_v12, %s1891_s12 }
  0xbc   :  { %2812 = vst [vmem:[#allocation2_spill] sm:$0xff] %v2090_v22  ;;  %1844 = vset.pattern.permute.xlu0 %v1894_v23  ;;  %v2184_v63 = vpop.permute.xlu0 %1260 }
  0xbd   :  { %2818 = vst [vmem:[#allocation8_spill] sm:$0xff] %v2184_v63 }
  0xbe   :  { %v2097_v25 = vpop.permute.xlu1 %972 }
  0xbf   :  { %v2100_v26 = vmul.f32 %v986_v24, %v2097_v25  ;;  %1402 = vperm.xlu0 %1844, %v1958_v7   ;;  %1061 = vrot.lane.b32.xlu1 %v2042_v9, %s1891_s12 }
  0xc1   :  { %2813 = vst [vmem:[#allocation3_spill] sm:$0xff] %v2100_v26 }
  0xc3   :  { %v2106_v28 = vpop.permute.xlu1 %1028  ;;  %1847 = vset.pattern.permute.xlu0 %v1895_v29  ;;  %1197 = vrot.lane.b32.xlu1 %v2048_v12, %s1892_s13  ;;  %v1014_v29 = vrot.slane %v2054_v49, %v1996_v40 }
  0xc4   :  { %v2109_v30 = vmul.f32 %v1042_v27, %v2106_v28  ;;  %1520 = vperm.xlu0 %1847, %v1958_v7   ;;  %v1010_v27 = vrot.slane %v2040_v8, %v1996_v40 }
  0xc6   :  { %2814 = vst [vmem:[#allocation4_spill] sm:$0xff] %v2109_v30  ;;  %v2243_v34 = vmul.f32 %v1010_v27, %v1001_v50 }
  0xc7   :  { %1199 = vrot.lane.b32.xlu1 %v2040_v8, %s1892_s13 }
  0xc8   :  { %1489 = vrot.lane.b32.xlu0 %v2054_v49, %s1896_s15  ;;  %v2153_v46 = vpop.permute.xlu1 %1086  ;;  %v982_v49 = vrot.slane %v2040_v8, %v1992_v36  ;;  %2825 = vst [vmem:[#allocation11_spill] sm:$0xff] %v2243_v34 }
  0xc9   :  { %1848 = vset.pattern.permute.xlu0 %v1897_v32  ;;  %v1018_v32 = vrot.slane %v2042_v9, %v1996_v40 }
  0xca   :  { %v2269_v63 = vmul.f32 %v982_v49, %v2097_v25 }
  0xcb   :  { %1203 = vrot.lane.b32.xlu1 %v2042_v9, %s1892_s13 }
  0xcc   :  { %1548 = vperm.xlu0 %1848, %v1958_v7   ;;  %2830 = vst [vmem:[#allocation16_spill] sm:$0xff] %v2269_v63 }
  0xcd   :  { %v2161_v48 = vpop.permute.xlu1 %1142 }
  0xcf   :  { %1343 = vrot.lane.b32.xlu1 %v2048_v12, %s1893_s14 }
  0xd0   :  { %1851 = vset.pattern.permute.xlu0 %v1859_v3 }
  0xd1   :  { %1642 = vperm.xlu0 %1851, %v2128_v35  }
  0xd2   :  { %v2166_v52 = vpop.permute.xlu1 %1170 }
  0xd3   :  { %1345 = vrot.lane.b32.xlu1 %v2040_v8, %s1893_s14 }
  0xd5   :  { %1854 = vset.pattern.permute.xlu0 %v1860_v4  ;;  %v1899_v4 = vmov 34  }
  0xd6   :  { %1704 = vperm.xlu0 %1854, %v2128_v35  }
  0xd7   :  { %1349 = vrot.lane.b32.xlu1 %v2042_v9, %s1893_s14  ;;  %v2177_v60 = vpop.permute.xlu1 %1288 }
  0xd8   :  { %2816 = vst [vmem:[#allocation6_spill] sm:$0xff] %v2177_v60 }
  0xda   :  { %1856 = vset.pattern.permute.xlu0 %v1857_v0 }
  0xdb   :  { %1430 = vperm.xlu1 %1845, %v1958_v7  }
  0xdc   :  { %v2186_v2 = vpop.permute.xlu1 %1316 }
  0xdd   :  { %2819 = vst [vmem:[#allocation9_spill] sm:$0xff] %v2186_v2  ;;  %v2245_v2 = vmul.f32 %v1014_v29, %v1001_v50 }
  0xdf   :  { %1846 = vset.pattern.permute.xlu1 %v1898_v44  ;;  %2826 = vst [vmem:[#allocation12_spill] sm:$0xff] %v2245_v2 }
  0xe0   :  { %1458 = vperm.xlu1 %1846, %v1958_v7  }
  0xe4   :  { %1485 = vrot.lane.b32.xlu1 %v2048_v12, %s1896_s15 }
  0xe5   :  { %1849 = vset.pattern.permute.xlu1 %v1899_v4 }
  0xe8   :  { %1487 = vrot.lane.b32.xlu1 %v2040_v8, %s1896_s15 }
  0xec   :  { %1491 = vrot.lane.b32.xlu1 %v2042_v9, %s1896_s15 }
  0xf0   :  { %1576 = vperm.xlu1 %1849, %v1958_v7  }
  0xf4   :  { %1850 = vset.pattern.permute.xlu1 %v1900_v54  ;;  %v962_v54 = vrot.slane %v2042_v9, %v1994_v38 }
  0xf5   :  { %1604 = vperm.xlu1 %1850, %v1958_v7   ;;  %v261_v7 = vand.u32 255, %v241_v58  ;;  %v990_v58 = vrot.slane %v2042_v9, %v1992_v36 }
  0xf7   :  { %v2196_v11 = vand.u32 15, %v261_v7  ;;  %vm2211_vm4 = vcmp.ge.s32.totalorder %v261_v7, 16  ;;  %v1046_v7 = vrot.slane %v2042_v9, %v1998_v42  ;;  %v2258_v9 = vmul.f32 %v954_v53, %v2087_v21 }
  0xf9   :  { %1852 = vset.pattern.permute.xlu1 %v1859_v3  ;;  %v2805_v3 = vand.u32 255, %v2181_v62  ;;  %vm349_vm5 = vcmp.ge.s32.totalorder %v2196_v11, 1  ;;  %v2295_v2 = vmul.f32 %v1046_v7, %v2106_v28  ;;  %vm353_vm13 = vcmp.lt.s32.totalorder %v2196_v11, 15 }
  0xfa   :  { %1668 = vperm.xlu1 %1852, %v1665_v56   ;;  %v978_v56 = vrot.slane %v2048_v12, %v1992_v36  ;;  %vm381_vm9 = vmand %vm2211_vm4, %vm349_vm5 }
  0xfb   :  { %v2209_v23 = vand.u32 15, %v2805_v3  ;;  %2834 = vst [vmem:[#allocation20_spill] sm:$0xff] %v2295_v2 }
  0xfc   :  { %v2266_v60 = vmul.f32 %v978_v56, %v2097_v25 }
  0xfd   :  { %vm350_vm7 = vcmp.ge.s32.totalorder %v2209_v23, 1  ;;  %vm354_vm15 = vcmp.lt.s32.totalorder %v2209_v23, 15 }
  0xfe   :  { %1853 = vset.pattern.permute.xlu1 %v1858_v1  ;;  %v1006_v1 = vrot.slane %v2048_v12, %v1996_v40  ;;  %2829 = vst [vmem:[#allocation15_spill] sm:$0xff] %v2266_v60 }
  0xff   :  { %1676 = vperm.xlu1 %1853, %v2128_v35  }
 0x100   :  { %v2241_v3 = vmul.f32 %v1006_v1, %v1001_v50  ;;  %v2261_v1 = vmul.f32 %v962_v54, %v2087_v21 }
 0x102   :  { %2824 = vst [vmem:[#allocation10_spill] sm:$0xff] %v2241_v3  ;;  %2828 = vst [vmem:[#allocation14_spill] sm:$0xff] %v2261_v1 }
 0x103   :  { %1855 = vset.pattern.permute.xlu1 %v1857_v0  ;;  %v950_v0 = vrot.slane %v2048_v12, %v1994_v38 }
 0x104   :  { %1732 = vperm.xlu1 %1855, %v2128_v35   ;;  %v1034_v35 = vrot.slane %v2048_v12, %v1998_v42  ;;  %v2252_v12 = vmul.f32 %v1018_v32, %v1001_v50 }
 0x105   :  { %v359_v44 = vpop.permute.xlu1 %358  ;;  %v367_v4 = vpop.permute.xlu0 %366  ;;  %v2255_v8 = vmul.f32 %v950_v0, %v2087_v21  ;;  %v2274_v0 = vmul.f32 %v990_v58, %v2097_v25 }
 0x106   :  { %2827 = vst [vmem:[#allocation13_spill] sm:$0xff] %v2252_v12  ;;  %v2277_v53 = vmul.f32 %v1034_v35, %v2106_v28  ;;  %v2292_v12 = vmul.f32 %v1038_v61, %v2106_v28 }
 0x107   :  { %2831 = vst [vmem:[#allocation17_spill] sm:$0xff] %v2274_v0 }
 0x108   :  { %2832 = vst [vmem:[#allocation18_spill] sm:$0xff] %v2277_v53  ;;  %2833 = vst [vmem:[#allocation19_spill] sm:$0xff] %v2292_v12 }
 0x109   :  { %v2263_v27 = vpop.permute.xlu0 %516  ;;  %v365_v29 = vpop.permute.xlu1 %364 }
 0x10a   :  { %v371_v50 = vsel %vm370_vm3, %v365_v29, %v367_v4  ;;  %v378_v32 = vsel %vm370_vm3, %v359_v44, %v365_v29 }
 0x10b   :  { %v391_v21 = vsel %vm379_vm6, %v378_v32, 0.0  ;;  %v392_v54 = vsel %vm348_vm2, %v371_v50, 0.0  ;;  %vm675_vm6 = vmand %vm2211_vm4, %vm353_vm13 }
 0x10c   :  { %v403_v56 = vrot.slane %v391_v21, %v1994_v38  ;;  %v407_v59 = vrot.slane %v392_v54, %v1994_v38  ;;  %v436_v49 = vrot.slane %v391_v21, %v1992_v36  ;;  %v440_v30 = vrot.slane %v392_v54, %v1992_v36 }
 0x10d   :  { %v464_v29 = vrot.slane %v391_v21, %v1996_v40  ;;  %v468_v25 = vrot.slane %v392_v54, %v1996_v40  ;;  %v492_v58 = vrot.slane %v391_v21, %v1998_v42  ;;  %v496_v35 = vrot.slane %v392_v54, %v1998_v42  ;;  %v2289_v32 = vpop.permute.xlu0 %520  ;;  %v369_v50 = vpop.permute.xlu1 %368 }
 0x10e   :  { %v416_v62 = vmul.f32 %v403_v56, %v2114_v31  ;;  %v417_v0 = vmul.f32 %v407_v59, %v2114_v31  ;;  %v449_v21 = vmul.f32 %v436_v49, %v2037_v57  ;;  %v450_v54 = vmul.f32 %v440_v30, %v2037_v57 }
 0x10f   :  { %v477_v26 = vmul.f32 %v464_v29, %v2120_v33  ;;  %v478_v61 = vmul.f32 %v468_v25, %v2120_v33  ;;  %v372_v56 = vsel %vm370_vm3, %v367_v4, %v369_v50  ;;  %v373_v59 = vsel %vm370_vm3, %v369_v50, %v359_v44  ;;  %vm673_vm3 = vmand %vm2198_vm0, %vm351_vm10 }
 0x110   :  { %v425_v28 = vadd.f32 %v2031_v43, %v416_v62  ;;  %v426_v7 = vadd.f32 %v2031_v43, %v417_v0  ;;  %v505_v2 = vmul.f32 %v492_v58, %v2044_v10  ;;  %v506_v1 = vmul.f32 %v496_v35, %v2044_v10 }
 0x111   :  { %v393_v22 = vsel %vm381_vm9, %v372_v56, 0.0  ;;  %v394_v30 = vsel %vm350_vm7, %v373_v59, 0.0  ;;  %v2315_v49 = vpop.permute.xlu0 %655  ;;  %v514_v29 = vpop.permute.xlu1 %513 }
 0x112   :  { %v453_v25 = vadd.f32 %v449_v21, %v425_v28  ;;  %v454_v53 = vadd.f32 %v450_v54, %v426_v7  ;;  %v411_v62 = vrot.slane %v393_v22, %v1994_v38  ;;  %v415_v0 = vrot.slane %v394_v30, %v1994_v38 }
 0x113   :  { %v444_v4 = vrot.slane %v393_v22, %v1992_v36  ;;  %v448_v44 = vrot.slane %v394_v30, %v1992_v36  ;;  %v472_v58 = vrot.slane %v393_v22, %v1996_v40  ;;  %v476_v35 = vrot.slane %v394_v30, %v1996_v40 }
 0x114   :  { %v481_v50 = vadd.f32 %v477_v26, %v453_v25  ;;  %v482_v56 = vadd.f32 %v478_v61, %v454_v53  ;;  %v418_v59 = vmul.f32 %v411_v62, %v2114_v31  ;;  %v419_v12 = vmul.f32 %v415_v0, %v2114_v31 }
 0x115   :  { %v451_v21 = vmul.f32 %v444_v4, %v2037_v57  ;;  %v452_v54 = vmul.f32 %v448_v44, %v2037_v57  ;;  %v479_v28 = vmul.f32 %v472_v58, %v2120_v33  ;;  %v480_v7 = vmul.f32 %v476_v35, %v2120_v33  ;;  %v519_v3 = vpop.permute.xlu1 %518  ;;  %v2339_v25 = vpop.permute.xlu0 %660 }
 0x116   :  { %v509_v34 = vadd.f32 %v505_v2, %v481_v50  ;;  %v2329_v63 = vadd.f32 %v506_v1, %v482_v56  ;;  %v427_v60 = vadd.f32 %v2031_v43, %v418_v59  ;;  %v428_v26 = vadd.f32 %v2031_v43, %v419_v12 }
 0x117   :  { %v500_v53 = vrot.slane %v393_v22, %v1998_v42  ;;  %v504_v31 = vrot.slane %v394_v30, %v1998_v42  ;;  %v525_v61 = vsel %vm522_vm8, %v2289_v32, %v514_v29  ;;  %v530_v57 = vsel %vm522_vm8, %v514_v29, %v2263_v27 }
 0x118   :  { %v455_v33 = vadd.f32 %v451_v21, %v427_v60  ;;  %v456_v2 = vadd.f32 %v452_v54, %v428_v26  ;;  %v539_v1 = vsel %vm2198_vm0, %v530_v57, 0.0  ;;  %v562_v62 = vrot.slane %v525_v61, %v1994_v38 }
 0x119   :  { %v507_v43 = vmul.f32 %v500_v53, %v2044_v10  ;;  %v508_v22 = vmul.f32 %v504_v31, %v2044_v10  ;;  %v550_v12 = vrot.slane %v539_v1, %v1994_v38  ;;  %v578_v30 = vrot.slane %v539_v1, %v1992_v36  ;;  %v659_v29 = vpop.permute.xlu1 %658  ;;  %v2361_v31 = vpop.permute.xlu0 %806 }
 0x11a   :  { %v483_v0 = vadd.f32 %v479_v28, %v455_v33  ;;  %v484_v4 = vadd.f32 %v480_v7, %v456_v2  ;;  %v566_v60 = vmul.f32 %v562_v62, %v2050_v13  ;;  %v590_v44 = vrot.slane %v525_v61, %v1992_v36 }
 0x11b   :  { %v563_v58 = vmul.f32 %v550_v12, %v2050_v13  ;;  %v591_v35 = vmul.f32 %v578_v30, %v2132_v37  ;;  %v606_v50 = vrot.slane %v539_v1, %v1996_v40  ;;  %v618_v10 = vrot.slane %v525_v61, %v1996_v40 }
 0x11c   :  { %v511_v56 = vadd.f32 %v507_v43, %v483_v0  ;;  %v512_v59 = vadd.f32 %v508_v22, %v484_v4  ;;  %v594_v21 = vmul.f32 %v590_v44, %v2132_v37  ;;  %v634_v54 = vrot.slane %v539_v1, %v1998_v42 }
 0x11d   :  { %v567_v28 = vadd.f32 %v563_v58, %v509_v34  ;;  %v619_v7 = vmul.f32 %v606_v50, %v2058_v14  ;;  %v622_v26 = vmul.f32 %v618_v10, %v2058_v14  ;;  %v646_v53 = vrot.slane %v525_v61, %v1998_v42  ;;  %v2363_v57 = vpop.permute.xlu1 %662 }
 0x11e   :  { %v570_v33 = vadd.f32 %v566_v60, %v512_v59  ;;  %v647_v2 = vmul.f32 %v634_v54, %v2062_v15  ;;  %v523_v62 = vsel %vm522_vm8, %v2263_v27, %v519_v3  ;;  %v524_v1 = vsel %vm522_vm8, %v519_v3, %v2289_v32 }
 0x11f   :  { %v595_v34 = vadd.f32 %v591_v35, %v567_v28  ;;  %v650_v43 = vmul.f32 %v646_v53, %v2062_v15  ;;  %v541_v61 = vsel %vm2211_vm4, %v524_v1, 0.0  ;;  %v554_v22 = vrot.slane %v523_v62, %v1994_v38 }
 0x120   :  { %v598_v12 = vadd.f32 %v594_v21, %v570_v33  ;;  %v558_v30 = vrot.slane %v541_v61, %v1994_v38  ;;  %v582_v0 = vrot.slane %v523_v62, %v1992_v36  ;;  %v586_v27 = vrot.slane %v541_v61, %v1992_v36 }
 0x121   :  { %v623_v4 = vadd.f32 %v619_v7, %v595_v34  ;;  %v564_v3 = vmul.f32 %v554_v22, %v2050_v13  ;;  %v610_v32 = vrot.slane %v523_v62, %v1996_v40  ;;  %v614_v60 = vrot.slane %v541_v61, %v1996_v40  ;;  %v2381_v44 = vpop.permute.xlu1 %801  ;;  %v2394_v7 = vpop.permute.xlu0 %1057 }
 0x122   :  { %v626_v58 = vadd.f32 %v622_v26, %v598_v12  ;;  %v565_v35 = vmul.f32 %v558_v30, %v2050_v13  ;;  %v592_v50 = vmul.f32 %v582_v0, %v2132_v37  ;;  %v593_v10 = vmul.f32 %v586_v27, %v2132_v37 }
 0x123   :  { %v651_v59 = vadd.f32 %v647_v2, %v623_v4  ;;  %v568_v21 = vadd.f32 %v564_v3, %v2329_v63  ;;  %v620_v54 = vmul.f32 %v610_v32, %v2058_v14  ;;  %v621_v28 = vmul.f32 %v614_v60, %v2058_v14 }
 0x124   :  { %v2396_v13 = vadd.f32 %v650_v43, %v626_v58  ;;  %v569_v26 = vadd.f32 %v565_v35, %v511_v56  ;;  %v638_v37 = vrot.slane %v523_v62, %v1998_v42  ;;  %v642_v53 = vrot.slane %v541_v61, %v1998_v42 }
 0x125   :  { %v596_v33 = vadd.f32 %v592_v50, %v568_v21  ;;  %v665_v63 = vsel %vm664_vm11, %v659_v29, %v2339_v25  ;;  %v672_v14 = vsel %vm664_vm11, %v2315_v49, %v659_v29  ;;  %v666_v20 = vsel %vm664_vm11, %v2339_v25, %v2363_v57  ;;  %v2407_v2 = vpop.permute.xlu1 %804  ;;  %v2425_v32 = vpop.permute.xlu0 %1059 }
 0x126   :  { %v597_v1 = vadd.f32 %v593_v10, %v569_v26  ;;  %v648_v56 = vmul.f32 %v638_v37, %v2062_v15  ;;  %v649_v62 = vmul.f32 %v642_v53, %v2062_v15  ;;  %v685_v34 = vsel %vm673_vm3, %v672_v14, 0.0 }
 0x127   :  { %v624_v43 = vadd.f32 %v620_v54, %v596_v33  ;;  %v686_v61 = vsel %vm352_vm12, %v665_v63, 0.0  ;;  %v696_v22 = vrot.slane %v685_v34, %v1994_v38  ;;  %v724_v29 = vrot.slane %v685_v34, %v1992_v36 }
 0x128   :  { %v625_v12 = vadd.f32 %v621_v28, %v597_v1  ;;  %v700_v30 = vrot.slane %v686_v61, %v1994_v38  ;;  %v728_v25 = vrot.slane %v686_v61, %v1992_v36  ;;  %v752_v0 = vrot.slane %v685_v34, %v1996_v40 }
 0x129   :  { %vm810_vm0 = vcmask 7168   ;;  %v652_v27 = vadd.f32 %v648_v56, %v624_v43  ;;  %v709_v15 = vmul.f32 %v696_v22, %v2139_v39  ;;  %v737_v4 = vmul.f32 %v724_v29, %v2066_v16  ;;  %v2427_v60 = vpop.permute.xlu1 %808 }
 0x12a   :  { %v756_v3 = vrot.slane %v686_v61, %v1996_v40  ;;  %v653_v58 = vadd.f32 %v649_v62, %v625_v12  ;;  %v710_v35 = vmul.f32 %v700_v30, %v2139_v39  ;;  %v738_v50 = vmul.f32 %v728_v25, %v2066_v16 }
 0x12b   :  { %v765_v10 = vmul.f32 %v752_v0, %v2070_v17  ;;  %v713_v21 = vadd.f32 %v709_v15, %v651_v59  ;;  %v780_v28 = vrot.slane %v685_v34, %v1998_v42  ;;  %v784_v26 = vrot.slane %v686_v61, %v1998_v42 }
 0x12c   :  { %v766_v54 = vmul.f32 %v756_v3, %v2070_v17  ;;  %v714_v24 = vadd.f32 %v710_v35, %v652_v27  ;;  %v667_v37 = vsel %vm664_vm11, %v2363_v57, %v2315_v49  ;;  %v687_v53 = vsel %vm675_vm6, %v666_v20, 0.0 }
 0x12d   :  { %v1065_v33 = vsel %vm1063_vm14, %v2394_v7, %v2425_v32  ;;  %v741_v63 = vadd.f32 %v737_v4, %v713_v21  ;;  %v793_v14 = vmul.f32 %v780_v28, %v2146_v41  ;;  %v794_v59 = vmul.f32 %v784_v26, %v2146_v41  ;;  %v2445_v56 = vpop.permute.xlu1 %1055 }
 0x12e   :  { %v688_v1 = vsel %vm354_vm15, %v667_v37, 0.0  ;;  %v742_v62 = vadd.f32 %v738_v50, %v714_v24  ;;  %v704_v34 = vrot.slane %v687_v53, %v1994_v38  ;;  %v732_v57 = vrot.slane %v687_v53, %v1992_v36 }
 0x12f   :  { %v708_v49 = vrot.slane %v688_v1, %v1994_v38  ;;  %v769_v20 = vadd.f32 %v765_v10, %v741_v63  ;;  %v736_v43 = vrot.slane %v688_v1, %v1992_v36  ;;  %v760_v61 = vrot.slane %v687_v53, %v1996_v40 }
 0x130   :  { %v764_v22 = vrot.slane %v688_v1, %v1996_v40  ;;  %v770_v29 = vadd.f32 %v766_v54, %v742_v62  ;;  %v711_v12 = vmul.f32 %v704_v34, %v2139_v39  ;;  %v739_v25 = vmul.f32 %v732_v57, %v2066_v16 }
 0x131   :  { %v712_v30 = vmul.f32 %v708_v49, %v2139_v39  ;;  %v797_v0 = vadd.f32 %v793_v14, %v769_v20  ;;  %v740_v27 = vmul.f32 %v736_v43, %v2066_v16  ;;  %v767_v15 = vmul.f32 %v760_v61, %v2070_v17  ;;  %v2461_v21 = vpop.permute.xlu1 %1061 }
 0x132   :  { %v768_v4 = vmul.f32 %v764_v22, %v2070_v17  ;;  %v798_v3 = vadd.f32 %v794_v59, %v770_v29  ;;  %v715_v35 = vadd.f32 %v711_v12, %v653_v58  ;;  %v788_v10 = vrot.slane %v687_v53, %v1998_v42 }
 0x133   :  { %v716_v50 = vadd.f32 %v712_v30, %v2396_v13  ;;  %v792_v54 = vrot.slane %v688_v1, %v1998_v42  ;;  %v1082_v39 = vsel %vm352_vm12, %v1065_v33, 0.0  ;;  %v811_v16 = vsel %vm810_vm0, %v2407_v2, %v2361_v31 }
 0x134   :  { %v818_v17 = vsel %vm810_vm0, %v2381_v44, %v2407_v2  ;;  %v743_v58 = vadd.f32 %v739_v25, %v715_v35  ;;  %v795_v13 = vmul.f32 %v788_v10, %v2146_v41  ;;  %v1096_v26 = vrot.slane %v1082_v39, %v1994_v38 }
 0x135   :  { %v744_v28 = vadd.f32 %v740_v27, %v716_v50  ;;  %v796_v24 = vmul.f32 %v792_v54, %v2146_v41  ;;  %v1124_v37 = vrot.slane %v1082_v39, %v1992_v36  ;;  %v1152_v53 = vrot.slane %v1082_v39, %v1996_v40  ;;  %v2483_v1 = vpop.permute.xlu1 %1197 }
 0x136   :  { %v1180_v33 = vrot.slane %v1082_v39, %v1998_v42  ;;  %v771_v63 = vadd.f32 %v767_v15, %v743_v58  ;;  %v2479_v59 = vmul.f32 %v1096_v26, %v2153_v46  ;;  %v827_v2 = vsel %vm347_vm1, %v818_v17, 0.0 }
 0x137   :  { %v772_v14 = vadd.f32 %v768_v4, %v744_v28  ;;  %v2486_v62 = vmul.f32 %v1124_v37, %v2164_v51  ;;  %v2489_v41 = vmul.f32 %v1152_v53, %v2161_v48  ;;  %v828_v49 = vsel %vm348_vm2, %v811_v16, 0.0 }
 0x138   :  { %v2492_v34 = vmul.f32 %v1180_v33, %v2166_v52  ;;  %v799_v57 = vadd.f32 %v795_v13, %v771_v63  ;;  %v838_v43 = vrot.slane %v827_v2, %v1994_v38  ;;  %v842_v61 = vrot.slane %v828_v49, %v1994_v38 }
 0x139   :  { %v800_v20 = vadd.f32 %v796_v24, %v772_v14  ;;  %v866_v22 = vrot.slane %v827_v2, %v1992_v36  ;;  %v870_v29 = vrot.slane %v828_v49, %v1992_v36  ;;  %v894_v12 = vrot.slane %v827_v2, %v1996_v40  ;;  %v2510_v39 = vpop.permute.xlu1 %1199 }
 0x13a   :  { %v898_v30 = vrot.slane %v828_v49, %v1996_v40  ;;  %v851_v25 = vmul.f32 %v838_v43, %v2149_v45  ;;  %v852_v27 = vmul.f32 %v842_v61, %v2149_v45  ;;  %v922_v15 = vrot.slane %v827_v2, %v1998_v42 }
 0x13b   :  { %v926_v4 = vrot.slane %v828_v49, %v1998_v42  ;;  %v879_v35 = vmul.f32 %v866_v22, %v2076_v18  ;;  %v880_v50 = vmul.f32 %v870_v29, %v2076_v18  ;;  %v907_v10 = vmul.f32 %v894_v12, %v2081_v19 }
 0x13c   :  { %v908_v54 = vmul.f32 %v898_v30, %v2081_v19  ;;  %v855_v16 = vadd.f32 %v851_v25, %v797_v0  ;;  %v856_v17 = vadd.f32 %v852_v27, %v798_v3  ;;  %v935_v58 = vmul.f32 %v922_v15, %v2155_v47 }
 0x13d   :  { %v936_v28 = vmul.f32 %v926_v4, %v2155_v47  ;;  %v812_v13 = vsel %vm810_vm0, %v2361_v31, %v2427_v60  ;;  %v813_v26 = vsel %vm810_vm0, %v2427_v60, %v2381_v44  ;;  %v1064_v24 = vsel %vm1063_vm14, %v2445_v56, %v2394_v7  ;;  %v2540_v29 = vpop.permute.xlu1 %1203 }
 0x13e   :  { %v1066_v0 = vsel %vm1063_vm14, %v2425_v32, %v2461_v21  ;;  %v883_v3 = vadd.f32 %v879_v35, %v855_v16  ;;  %v884_v37 = vadd.f32 %v880_v50, %v856_v17  ;;  %v829_v53 = vsel %vm349_vm5, %v812_v13, 0.0 }
 0x13f   :  { %v830_v31 = vsel %vm350_vm7, %v813_v26, 0.0  ;;  %v846_v33 = vrot.slane %v829_v53, %v1994_v38  ;;  %v874_v60 = vrot.slane %v829_v53, %v1992_v36  ;;  %v902_v32 = vrot.slane %v829_v53, %v1996_v40 }
 0x140   :  { %v850_v44 = vrot.slane %v830_v31, %v1994_v38  ;;  %v878_v7 = vrot.slane %v830_v31, %v1992_v36  ;;  %v911_v63 = vadd.f32 %v907_v10, %v883_v3  ;;  %v912_v14 = vadd.f32 %v908_v54, %v884_v37  ;;  %v2840_v37 = vld [vmem:[#allocation11_spill] sm:$0xff] }
 0x141   :  { %v906_v2 = vrot.slane %v830_v31, %v1996_v40  ;;  %v853_v49 = vmul.f32 %v846_v33, %v2149_v45  ;;  %v881_v61 = vmul.f32 %v874_v60, %v2076_v18  ;;  %v909_v25 = vmul.f32 %v902_v32, %v2081_v19 }
 0x142   :  { %v854_v43 = vmul.f32 %v850_v44, %v2149_v45  ;;  %v882_v22 = vmul.f32 %v878_v7, %v2076_v18  ;;  %v939_v12 = vadd.f32 %v935_v58, %v911_v63  ;;  %v940_v30 = vadd.f32 %v936_v28, %v912_v14  ;;  %v2839_v28 = vld [vmem:[#allocation16_spill] sm:$0xff] }
 0x143   :  { %v910_v27 = vmul.f32 %v906_v2, %v2081_v19  ;;  %v857_v15 = vadd.f32 %v853_v49, %v799_v57  ;;  %v930_v35 = vrot.slane %v829_v53, %v1998_v42  ;;  %v934_v50 = vrot.slane %v830_v31, %v1998_v42  ;;  %v2841_v31 = vld [vmem:[#allocation10_spill] sm:$0xff]  ;;  %v2842_v2 = vld [vmem:[#allocation19_spill] sm:$0xff] }
 0x144   :  { %v858_v4 = vadd.f32 %v854_v43, %v800_v20  ;;  %v967_v45 = vadd.f32 %v2255_v8, %v939_v12  ;;  %v968_v10 = vadd.f32 %v2258_v9, %v940_v30  ;;  %v1081_v18 = vsel %vm351_vm10, %v1064_v24, 0.0  ;;  %v2838_v8 = vld [vmem:[#allocation15_spill] sm:$0xff]  ;;  %v2843_v43 = vld [vmem:[#allocation18_spill] sm:$0xff] }
 0x145   :  { %v1072_v54 = vsel %vm1063_vm14, %v2461_v21, %v2445_v56  ;;  %v885_v16 = vadd.f32 %v881_v61, %v857_v15  ;;  %v937_v19 = vmul.f32 %v930_v35, %v2155_v47  ;;  %v938_v57 = vmul.f32 %v934_v50, %v2155_v47  ;;  %v2844_v30 = vld [vmem:[#allocation2_spill] sm:$0xff] }
 0x146   :  { %v886_v17 = vadd.f32 %v882_v22, %v858_v4  ;;  %v2835_v20 = vand.u32 255, %v2170_v55  ;;  %v995_v9 = vadd.f32 %v2838_v8, %v967_v45  ;;  %v996_v13 = vadd.f32 %v2839_v28, %v968_v10  ;;  %v2567_v55 = vpop.permute.xlu1 %1343 }
 0x147   :  { %v1092_v26 = vrot.slane %v1081_v18, %v1994_v38  ;;  %v1120_v56 = vrot.slane %v1081_v18, %v1992_v36  ;;  %vm1205_vm8 = vcmask 924672   ;;  %v913_v21 = vadd.f32 %v909_v25, %v885_v16  ;;  %v2846_v16 = vld [vmem:[#allocation3_spill] sm:$0xff] }
 0x148   :  { %vm2557_vm4 = vcmp.lt.s32.totalorder %v2835_v20, 240  ;;  %v914_v24 = vadd.f32 %v910_v27, %v886_v17  ;;  %v1148_v3 = vrot.slane %v1081_v18, %v1996_v40  ;;  %v1176_v47 = vrot.slane %v1081_v18, %v1998_v42  ;;  %v2845_v27 = vld [vmem:[#allocation14_spill] sm:$0xff]  ;;  %v2847_v17 = vld [vmem:[#allocation17_spill] sm:$0xff] }
 0x149   :  { %v1024_v53 = vadd.f32 %v2840_v37, %v996_v13  ;;  %v1023_v33 = vadd.f32 %v2841_v31, %v995_v9  ;;  %v1105_v44 = vmul.f32 %v1092_v26, %v2153_v46  ;;  %v1133_v60 = vmul.f32 %v1120_v56, %v2164_v51  ;;  %v2848_v26 = vld [vmem:[#allocation7_spill] sm:$0xff]  ;;  %vm1216_vm11 = vmand %vm2557_vm4, %vm348_vm2 }
 0x14a   :  { %v941_v7 = vadd.f32 %v937_v19, %v913_v21  ;;  %v942_v63 = vadd.f32 %v938_v57, %v914_v24  ;;  %v1161_v14 = vmul.f32 %v1148_v3, %v2161_v48  ;;  %v1189_v32 = vmul.f32 %v1176_v47, %v2166_v52  ;;  %v2592_v20 = vpop.permute.xlu1 %1345  ;;  %v2852_v24 = vld [vmem:[#allocation12_spill] sm:$0xff]  ;;  %v2853_v47 = vld [vmem:[#allocation13_spill] sm:$0xff] }
 0x14b   :  { %v1052_v49 = vadd.f32 %v2842_v2, %v1024_v53  ;;  %v1051_v61 = vadd.f32 %v2843_v43, %v1023_v33  ;;  %v1083_v22 = vsel %vm353_vm13, %v1066_v0, 0.0  ;;  %v1084_v12 = vsel %vm354_vm15, %v1072_v54, 0.0  ;;  %v2855_v2 = vld [vmem:[#allocation20_spill] sm:$0xff] }
 0x14c   :  { %v969_v25 = vadd.f32 %v2844_v30, %v941_v7  ;;  %v970_v15 = vadd.f32 %v2845_v27, %v942_v63  ;;  %v1100_v4 = vrot.slane %v1083_v22, %v1994_v38  ;;  %v1104_v35 = vrot.slane %v1084_v12, %v1994_v38  ;;  %v2854_v7 = vld [vmem:[#allocation4_spill] sm:$0xff] }
 0x14d   :  { %v1109_v50 = vadd.f32 %v1105_v44, %v1051_v61  ;;  %v1128_v45 = vrot.slane %v1083_v22, %v1992_v36  ;;  %v1132_v10 = vrot.slane %v1084_v12, %v1992_v36  ;;  %v1156_v18 = vrot.slane %v1083_v22, %v1996_v40 }
 0x14e   :  { %v997_v0 = vadd.f32 %v2846_v16, %v969_v25  ;;  %v998_v19 = vadd.f32 %v2847_v17, %v970_v15  ;;  %v1107_v54 = vmul.f32 %v1100_v4, %v2153_v46  ;;  %v1108_v57 = vmul.f32 %v1104_v35, %v2153_v46  ;;  %v2626_v15 = vpop.permute.xlu1 %1349  ;;  %v2856_v16 = vld [vmem:[#allocation5_spill] sm:$0xff]  ;;  %v2857_v17 = vld [vmem:[#allocation8_spill] sm:$0xff] }
 0x14f   :  { %v1137_v8 = vadd.f32 %v1133_v60, %v1109_v50  ;;  %v1135_v9 = vmul.f32 %v1128_v45, %v2164_v51  ;;  %v1136_v28 = vmul.f32 %v1132_v10, %v2164_v51  ;;  %v1160_v13 = vrot.slane %v1084_v12, %v1996_v40  ;;  %v1202_v60 = vpop.permute.xlu0 %1201 }
 0x150   :  { %v2849_v56 = vand.u32 255, %v2848_v26  ;;  %v1025_v3 = vadd.f32 %v2852_v24, %v997_v0  ;;  %v1026_v37 = vadd.f32 %v2853_v47, %v998_v19  ;;  %v1163_v46 = vmul.f32 %v1156_v18, %v2161_v48 }
 0x151   :  { %v1184_v53 = vrot.slane %v1083_v22, %v1998_v42  ;;  %v1165_v31 = vadd.f32 %v1161_v14, %v1137_v8  ;;  %v1164_v33 = vmul.f32 %v1160_v13, %v2161_v48  ;;  %v1188_v51 = vrot.slane %v1084_v12, %v1998_v42 }
 0x152   :  { %vm2599_vm9 = vcmp.lt.s32.totalorder %v2849_v56, 240  ;;  %v1110_v44 = vadd.f32 %v2479_v59, %v1052_v49  ;;  %vm1351_vm14 = vcmask 916480   ;;  %v1053_v63 = vadd.f32 %v2854_v7, %v1025_v3  ;;  %v2858_v56 = vld [vmem:[#allocation6_spill] sm:$0xff] }
 0x153   :  { %v1054_v43 = vadd.f32 %v2855_v2, %v1026_v37  ;;  %v1191_v61 = vmul.f32 %v1184_v53, %v2166_v52  ;;  %v1206_v48 = vsel %vm1205_vm8, %v2483_v1, %v2510_v39  ;;  %v1193_v14 = vadd.f32 %v1189_v32, %v1165_v31  ;;  %v2632_v45 = vpop.permute.xlu0 %1374 }
 0x154   :  { %v1192_v59 = vmul.f32 %v1188_v51, %v2166_v52  ;;  %v1138_v49 = vadd.f32 %v2486_v62, %v1110_v44  ;;  %v1207_v22 = vsel %vm1205_vm8, %v2510_v39, %v1202_v60  ;;  %v1111_v12 = vadd.f32 %v1107_v54, %v1053_v63 }
 0x155   :  { %v1112_v30 = vadd.f32 %v1108_v57, %v1054_v43  ;;  %v1227_v25 = vsel %vm347_vm1, %v1206_v48, 0.0  ;;  %v1228_v27 = vsel %vm1216_vm11, %v1207_v22, 0.0  ;;  %vm1218_vm1 = vmand %vm2599_vm9, %vm350_vm7  ;;  %v1208_v44 = vsel %vm1205_vm8, %v1202_v60, %v2540_v29 }
 0x156   :  { %v1166_v4 = vadd.f32 %v2489_v41, %v1138_v49  ;;  %v1238_v35 = vrot.slane %v1227_v25, %v1994_v38  ;;  %v1242_v32 = vrot.slane %v1228_v27, %v1994_v38  ;;  %v1266_v52 = vrot.slane %v1227_v25, %v1992_v36  ;;  %vm1506_vm7 = vmand %vm2599_vm9, %vm354_vm15 }
 0x157   :  { %v1139_v62 = vadd.f32 %v1135_v9, %v1111_v12  ;;  %v1140_v50 = vadd.f32 %v1136_v28, %v1112_v30  ;;  %v1270_v39 = vrot.slane %v1228_v27, %v1992_v36  ;;  %v1294_v10 = vrot.slane %v1227_v25, %v1996_v40  ;;  %v2642_v28 = vpop.permute.xlu1 %1430  ;;  %v1348_v7 = vpop.permute.xlu0 %1347 }
 0x158   :  { %v1194_v18 = vadd.f32 %v2492_v34, %v1166_v4  ;;  %v1251_v0 = vmul.f32 %v1238_v35, %v2856_v16  ;;  %v1252_v41 = vmul.f32 %v1242_v32, %v2856_v16  ;;  %v1279_v19 = vmul.f32 %v1266_v52, %v2857_v17 }
 0x159   :  { %v1167_v54 = vadd.f32 %v1163_v46, %v1139_v62  ;;  %v1168_v57 = vadd.f32 %v1164_v33, %v1140_v50  ;;  %v1280_v8 = vmul.f32 %v1270_v39, %v2857_v17  ;;  %v1298_v9 = vrot.slane %v1228_v27, %v1996_v40  ;;  %v2859_v33 = vld [vmem:[#allocation9_spill] sm:$0xff] }
 0x15a   :  { %v1255_v13 = vadd.f32 %v1251_v0, %v1193_v14  ;;  %v1256_v26 = vadd.f32 %v1252_v41, %v1194_v18  ;;  %v1307_v24 = vmul.f32 %v1294_v10, %v2858_v56  ;;  %v1322_v34 = vrot.slane %v1227_v25, %v1998_v42 }
 0x15b   :  { %v1195_v3 = vadd.f32 %v1191_v61, %v1167_v54  ;;  %v1196_v47 = vadd.f32 %v1192_v59, %v1168_v57  ;;  %v1308_v37 = vmul.f32 %v1298_v9, %v2858_v56  ;;  %v1326_v53 = vrot.slane %v1228_v27, %v1998_v42  ;;  %v2667_v49 = vpop.permute.xlu1 %1458  ;;  %v1403_v41 = vpop.permute.xlu0 %1402 }
 0x15c   :  { %v1283_v46 = vadd.f32 %v1279_v19, %v1255_v13  ;;  %v1284_v31 = vadd.f32 %v1280_v8, %v1256_v26  ;;  %v1335_v51 = vmul.f32 %v1322_v34, %v2859_v33  ;;  %v1214_v2 = vsel %vm1205_vm8, %v2540_v29, %v2483_v1 }
 0x15d   :  { %v1336_v63 = vmul.f32 %v1326_v53, %v2859_v33  ;;  %v1229_v43 = vsel %vm349_vm5, %v1208_v44, 0.0  ;;  %v2664_v61 = vsel %vm1351_vm14, %v2567_v55, %v2592_v20  ;;  %v1230_v59 = vsel %vm1218_vm1, %v1214_v2, 0.0  ;;  %vm1504_vm5 = vmand %vm2557_vm4, %vm352_vm12 }
 0x15e   :  { %v1311_v48 = vadd.f32 %v1307_v24, %v1283_v46  ;;  %v1312_v14 = vadd.f32 %v1308_v37, %v1284_v31  ;;  %v1246_v60 = vrot.slane %v1229_v43, %v1994_v38  ;;  %v1250_v22 = vrot.slane %v1230_v59, %v1994_v38 }
 0x15f   :  { %v1274_v12 = vrot.slane %v1229_v43, %v1992_v36  ;;  %v1278_v1 = vrot.slane %v1230_v59, %v1992_v36  ;;  %v1302_v29 = vrot.slane %v1229_v43, %v1996_v40  ;;  %v1306_v4 = vrot.slane %v1230_v59, %v1996_v40  ;;  %v2682_v0 = vpop.permute.xlu1 %1485 }
 0x160   :  { %v1339_v30 = vadd.f32 %v1335_v51, %v1311_v48  ;;  %v1340_v25 = vadd.f32 %v1336_v63, %v1312_v14  ;;  %v1253_v27 = vmul.f32 %v1246_v60, %v2856_v16  ;;  %v1254_v35 = vmul.f32 %v1250_v22, %v2856_v16  ;;  %v2706_v14 = vpop.permute.xlu0 %1520 }
 0x161   :  { %v1281_v32 = vmul.f32 %v1274_v12, %v2857_v17  ;;  %v1282_v52 = vmul.f32 %v1278_v1, %v2857_v17  ;;  %v1309_v62 = vmul.f32 %v1302_v29, %v2858_v56  ;;  %v1310_v39 = vmul.f32 %v1306_v4, %v2858_v56 }
 0x162   :  { %v1257_v50 = vadd.f32 %v1253_v27, %v1195_v3  ;;  %v1330_v10 = vrot.slane %v1229_v43, %v1998_v42  ;;  %v1334_v18 = vrot.slane %v1230_v59, %v1998_v42  ;;  %v1258_v19 = vadd.f32 %v1254_v35, %v1196_v47 }
 0x163   :  { %v1353_v16 = vsel %vm1351_vm14, %v2592_v20, %v1348_v7  ;;  %v1380_v54 = vrot.slane %v2664_v61, %v1994_v38  ;;  %v1408_v17 = vrot.slane %v2664_v61, %v1992_v36  ;;  %vm1493_vm2 = vcmask 908288   ;;  %v1488_v43 = vpop.permute.xlu1 %1487 }
 0x164   :  { %v1285_v57 = vadd.f32 %v1281_v32, %v1257_v50  ;;  %v1337_v8 = vmul.f32 %v1330_v10, %v2859_v33  ;;  %v1338_v9 = vmul.f32 %v1334_v18, %v2859_v33  ;;  %v1370_v13 = vsel %vm2557_vm4, %v1353_v16, 0.0 }
 0x165   :  { %v1286_v26 = vadd.f32 %v1282_v52, %v1258_v19  ;;  %v1384_v56 = vrot.slane %v1370_v13, %v1994_v38  ;;  %v1393_v24 = vmul.f32 %v1380_v54, %v2632_v45  ;;  %v1412_v20 = vrot.slane %v1370_v13, %v1992_v36  ;;  %v1490_v54 = vpop.permute.xlu0 %1489 }
 0x166   :  { %v1313_v34 = vadd.f32 %v1309_v62, %v1285_v57  ;;  %v1421_v3 = vmul.f32 %v1408_v17, %v1403_v41  ;;  %v1436_v47 = vrot.slane %v2664_v61, %v1996_v40  ;;  %v1440_v37 = vrot.slane %v1370_v13, %v1996_v40 }
 0x167   :  { %v1314_v53 = vadd.f32 %v1310_v39, %v1286_v26  ;;  %v1394_v46 = vmul.f32 %v1384_v56, %v2632_v45  ;;  %v1397_v31 = vadd.f32 %v1393_v24, %v1339_v30  ;;  %v1422_v33 = vmul.f32 %v1412_v20, %v1403_v41  ;;  %v1492_v16 = vpop.permute.xlu1 %1491 }
 0x168   :  { %v1341_v51 = vadd.f32 %v1337_v8, %v1313_v34  ;;  %v1464_v44 = vrot.slane %v2664_v61, %v1998_v42  ;;  %v1468_v63 = vrot.slane %v1370_v13, %v1998_v42  ;;  %v1354_v2 = vsel %vm1351_vm14, %v1348_v7, %v2626_v15 }
 0x169   :  { %v1342_v48 = vadd.f32 %v1338_v9, %v1314_v53  ;;  %v1398_v59 = vadd.f32 %v1394_v46, %v1340_v25  ;;  %v1360_v60 = vsel %vm1351_vm14, %v2626_v15, %v2567_v55  ;;  %v1388_v22 = vrot.slane %v1354_v2, %v1994_v38  ;;  %v1549_v46 = vpop.permute.xlu0 %1548 }
 0x16a   :  { %v1372_v12 = vsel %vm2599_vm9, %v1360_v60, 0.0  ;;  %v1416_v61 = vrot.slane %v1354_v2, %v1992_v36  ;;  %v1444_v1 = vrot.slane %v1354_v2, %v1996_v40  ;;  %v1472_v7 = vrot.slane %v1354_v2, %v1998_v42 }
 0x16b   :  { %v1392_v29 = vrot.slane %v1372_v12, %v1994_v38  ;;  %v1395_v30 = vmul.f32 %v1388_v22, %v2632_v45  ;;  %v1420_v25 = vrot.slane %v1372_v12, %v1992_v36  ;;  %v1448_v27 = vrot.slane %v1372_v12, %v1996_v40  ;;  %v1577_v5 = vpop.permute.xlu1 %1576 }
 0x16c   :  { %v1423_v55 = vmul.f32 %v1416_v61, %v1403_v41  ;;  %v1476_v15 = vrot.slane %v1372_v12, %v1998_v42  ;;  %v1426_v4 = vadd.f32 %v1422_v33, %v1398_v59  ;;  %v1425_v35 = vadd.f32 %v1421_v3, %v1397_v31 }
 0x16d   :  { %v1396_v32 = vmul.f32 %v1392_v29, %v2632_v45  ;;  %v1399_v52 = vadd.f32 %v1395_v30, %v1341_v51  ;;  %v1424_v62 = vmul.f32 %v1420_v25, %v1403_v41  ;;  %v1449_v50 = vmul.f32 %v1436_v47, %v2642_v28 }
 0x16e   :  { %v1450_v39 = vmul.f32 %v1440_v37, %v2642_v28  ;;  %v1451_v10 = vmul.f32 %v1444_v1, %v2642_v28  ;;  %v1452_v18 = vmul.f32 %v1448_v27, %v2642_v28  ;;  %v1477_v19 = vmul.f32 %v1464_v44, %v2667_v49 }
 0x16f   :  { %v1400_v17 = vadd.f32 %v1396_v32, %v1342_v48  ;;  %v1427_v57 = vadd.f32 %v1423_v55, %v1399_v52  ;;  %v1453_v8 = vadd.f32 %v1449_v50, %v1425_v35  ;;  %v1478_v9 = vmul.f32 %v1468_v63, %v2667_v49 }
 0x170   :  { %v1454_v45 = vadd.f32 %v1450_v39, %v1426_v4  ;;  %v1479_v41 = vmul.f32 %v1472_v7, %v2667_v49  ;;  %v1480_v13 = vmul.f32 %v1476_v15, %v2667_v49  ;;  %v1494_v28 = vsel %vm1493_vm2, %v2682_v0, %v1488_v43  ;;  %v1605_v52 = vpop.permute.xlu1 %1604 }
 0x171   :  { %v1428_v26 = vadd.f32 %v1424_v62, %v1400_v17  ;;  %v1455_v56 = vadd.f32 %v1451_v10, %v1427_v57  ;;  %v1481_v24 = vadd.f32 %v1477_v19, %v1453_v8  ;;  %v1495_v20 = vsel %vm1493_vm2, %v1488_v43, %v1490_v54 }
 0x172   :  { %v1482_v34 = vadd.f32 %v1478_v9, %v1454_v45  ;;  %v1515_v6 = vsel %vm351_vm10, %v1494_v28, 0.0  ;;  %v1516_v3 = vsel %vm1504_vm5, %v1495_v20, 0.0  ;;  %v1496_v58 = vsel %vm1493_vm2, %v1490_v54, %v1492_v16  ;;  %v1643_v28 = vpop.permute.xlu0 %1642 }
 0x173   :  { %v1456_v47 = vadd.f32 %v1452_v18, %v1428_v26  ;;  %v1483_v37 = vadd.f32 %v1479_v41, %v1455_v56  ;;  %v1526_v53 = vrot.slane %v1515_v6, %v1994_v38  ;;  %v1530_v49 = vrot.slane %v1516_v3, %v1994_v38 }
 0x174   :  { %v1554_v31 = vrot.slane %v1515_v6, %v1992_v36  ;;  %v1558_v33 = vrot.slane %v1516_v3, %v1992_v36  ;;  %v1582_v51 = vrot.slane %v1515_v6, %v1996_v40  ;;  %v1586_v44 = vrot.slane %v1516_v3, %v1996_v40 }
 0x175   :  { %v1484_v63 = vadd.f32 %v1480_v13, %v1456_v47  ;;  %v1539_v2 = vmul.f32 %v1526_v53, %v2706_v14  ;;  %v1540_v43 = vmul.f32 %v1530_v49, %v2706_v14  ;;  %v1610_v48 = vrot.slane %v1515_v6, %v1998_v42 }
 0x176   :  { %v1614_v59 = vrot.slane %v1516_v3, %v1998_v42  ;;  %v1567_v60 = vmul.f32 %v1554_v31, %v1549_v46  ;;  %v1568_v22 = vmul.f32 %v1558_v33, %v1549_v46  ;;  %v1502_v12 = vsel %vm1493_vm2, %v1492_v16, %v2682_v0  ;;  %v1705_v31 = vpop.permute.xlu0 %1704 }
 0x177   :  { %v1543_v61 = vadd.f32 %v1539_v2, %v1481_v24  ;;  %v1544_v23 = vadd.f32 %v1540_v43, %v1482_v34  ;;  %v1517_v21 = vsel %vm353_vm13, %v1496_v58, 0.0  ;;  %v1518_v1 = vsel %vm1506_vm7, %v1502_v12, 0.0  ;;  %v1669_v24 = vpop.permute.xlu1 %1668 }
 0x178   :  { %v1534_v7 = vrot.slane %v1517_v21, %v1994_v38  ;;  %v1538_v29 = vrot.slane %v1518_v1, %v1994_v38  ;;  %v1562_v30 = vrot.slane %v1517_v21, %v1992_v36  ;;  %v1566_v25 = vrot.slane %v1518_v1, %v1992_v36 }
 0x179   :  { %v1571_v27 = vadd.f32 %v1567_v60, %v1543_v61  ;;  %v1572_v55 = vadd.f32 %v1568_v22, %v1544_v23  ;;  %v1590_v15 = vrot.slane %v1517_v21, %v1996_v40  ;;  %v1594_v0 = vrot.slane %v1518_v1, %v1996_v40 }
 0x17a   :  { %v1541_v4 = vmul.f32 %v1534_v7, %v2706_v14  ;;  %v1542_v11 = vmul.f32 %v1538_v29, %v2706_v14  ;;  %v1569_v35 = vmul.f32 %v1562_v30, %v1549_v46  ;;  %v1570_v32 = vmul.f32 %v1566_v25, %v1549_v46 }
 0x17b   :  { %v1618_v62 = vrot.slane %v1517_v21, %v1998_v42  ;;  %v1622_v50 = vrot.slane %v1518_v1, %v1998_v42  ;;  %v1595_v39 = vmul.f32 %v1582_v51, %v1577_v5  ;;  %v1596_v10 = vmul.f32 %v1586_v44, %v1577_v5 }
 0x17c   :  { %v1545_v18 = vadd.f32 %v1541_v4, %v1483_v37  ;;  %v1546_v19 = vadd.f32 %v1542_v11, %v1484_v63  ;;  %v1597_v16 = vmul.f32 %v1590_v15, %v1577_v5  ;;  %v1598_v54 = vmul.f32 %v1594_v0, %v1577_v5  ;;  %v1677_v5 = vpop.permute.xlu1 %1676 }
 0x17d   :  { %v1599_v17 = vadd.f32 %v1595_v39, %v1571_v27  ;;  %v1600_v57 = vadd.f32 %v1596_v10, %v1572_v55  ;;  %v1623_v8 = vmul.f32 %v1610_v48, %v1605_v52  ;;  %v1624_v9 = vmul.f32 %v1614_v59, %v1605_v52 }
 0x17e   :  { %v1573_v45 = vadd.f32 %v1569_v35, %v1545_v18  ;;  %v1574_v41 = vadd.f32 %v1570_v32, %v1546_v19  ;;  %v1625_v14 = vmul.f32 %v1618_v62, %v1605_v52  ;;  %v1626_v13 = vmul.f32 %v1622_v50, %v1605_v52 }
 0x17f   :  { %v1627_v26 = vadd.f32 %v1623_v8, %v1599_v17  ;;  %v1628_v56 = vadd.f32 %v1624_v9, %v1600_v57 }
 0x180   :  { %v1601_v20 = vadd.f32 %v1597_v16, %v1573_v45  ;;  %v1602_v34 = vadd.f32 %v1598_v54, %v1574_v41  ;;  %v1733_v52 = vpop.permute.xlu1 %1732 }
 0x181   :  { %v1631_v6 = vmax.f32 %v1627_v26, 0.0  ;;  %v1632_v3 = vmax.f32 %v1628_v56, 0.0 }
 0x182   :  { %v1629_v58 = vadd.f32 %v1625_v14, %v1601_v20  ;;  %v1630_v47 = vadd.f32 %v1626_v13, %v1602_v34 }
 0x183   :  { %v1635_v37 = vmin.f32 %v1631_v6, 1.0  ;;  %v1636_v53 = vmin.f32 %v1632_v3, 1.0 }
 0x184   :  { %v1633_v49 = vmax.f32 %v1629_v58, 0.0  ;;  %v1634_v46 = vmax.f32 %v1630_v47, 0.0 }
 0x185   :  { %v1648_v33 = vrot.slane %v1635_v37, %v1994_v38  ;;  %v1652_v51 = vrot.slane %v1636_v53, %v1994_v38  ;;  %v1710_v44 = vrot.slane %v1635_v37, %v1996_v40  ;;  %v1714_v43 = vrot.slane %v1636_v53, %v1996_v40 }
 0x186   :  { %v1637_v63 = vmin.f32 %v1633_v49, 1.0  ;;  %v1638_v2 = vmin.f32 %v1634_v46, 1.0  ;;  %v1686_v48 = vrot.slane %v1636_v53, %v1992_v36  ;;  %v1682_v12 = vrot.slane %v1635_v37, %v1992_v36 }
 0x187   :  { %v1661_v59 = vmul.f32 %v1648_v33, %v1643_v28  ;;  %v1662_v60 = vmul.f32 %v1652_v51, %v1643_v28  ;;  %v1723_v22 = vmul.f32 %v1710_v44, %v1705_v31  ;;  %v1724_v15 = vmul.f32 %v1714_v43, %v1705_v31 }
 0x188   :  { %v1656_v61 = vrot.slane %v1637_v63, %v1994_v38  ;;  %v1660_v23 = vrot.slane %v1638_v2, %v1994_v38  ;;  %v1718_v21 = vrot.slane %v1637_v63, %v1996_v40  ;;  %v1722_v1 = vrot.slane %v1638_v2, %v1996_v40 }
 0x189   :  { %v1671_v7 = vadd.f32 %v1669_v24, %v1661_v59  ;;  %v1672_v29 = vadd.f32 %v1669_v24, %v1662_v60  ;;  %v1690_v30 = vrot.slane %v1637_v63, %v1992_v36  ;;  %v1694_v25 = vrot.slane %v1638_v2, %v1992_v36 }
 0x18a   :  { %v1663_v27 = vmul.f32 %v1656_v61, %v1643_v28  ;;  %v1664_v55 = vmul.f32 %v1660_v23, %v1643_v28  ;;  %v1725_v0 = vmul.f32 %v1718_v21, %v1705_v31  ;;  %v1726_v4 = vmul.f32 %v1722_v1, %v1705_v31 }
 0x18b   :  { %v1695_v11 = vmul.f32 %v1682_v12, %v1677_v5  ;;  %v1696_v35 = vmul.f32 %v1686_v48, %v1677_v5  ;;  %v1697_v32 = vmul.f32 %v1690_v30, %v1677_v5  ;;  %v1698_v50 = vmul.f32 %v1694_v25, %v1677_v5 }
 0x18c   :  { %v1673_v38 = vadd.f32 %v1669_v24, %v1663_v27  ;;  %v1674_v62 = vadd.f32 %v1669_v24, %v1664_v55  ;;  %v1742_v40 = vrot.slane %v1636_v53, %v1998_v42  ;;  %v1746_v18 = vrot.slane %v1637_v63, %v1998_v42 }
 0x18d   :  { %v1699_v39 = vadd.f32 %v1695_v11, %v1671_v7  ;;  %v1700_v10 = vadd.f32 %v1696_v35, %v1672_v29  ;;  %v1738_v36 = vrot.slane %v1635_v37, %v1998_v42  ;;  %v1750_v54 = vrot.slane %v1638_v2, %v1998_v42 }
 0x18e   :  { %v1701_v19 = vadd.f32 %v1697_v32, %v1673_v38  ;;  %v1702_v16 = vadd.f32 %v1698_v50, %v1674_v62  ;;  %v1752_v17 = vmul.f32 %v1742_v40, %v1733_v52  ;;  %v1753_v14 = vmul.f32 %v1746_v18, %v1733_v52 }
 0x18f   :  { %v1728_v57 = vadd.f32 %v1724_v15, %v1700_v10  ;;  %v1727_v8 = vadd.f32 %v1723_v22, %v1699_v39  ;;  %v1751_v9 = vmul.f32 %v1738_v36, %v1733_v52  ;;  %v1754_v13 = vmul.f32 %v1750_v54, %v1733_v52 }
 0x190   :  { %v1729_v45 = vadd.f32 %v1725_v0, %v1701_v19  ;;  %v1730_v41 = vadd.f32 %v1726_v4, %v1702_v16 }
 0x191   :  { %v1755_v28 = vadd.f32 %v1751_v9, %v1727_v8  ;;  %v1756_v26 = vadd.f32 %v1752_v17, %v1728_v57 }
 0x192   :  { %v1757_v56 = vadd.f32 %v1753_v14, %v1729_v45  ;;  %v1758_v24 = vadd.f32 %v1754_v13, %v1730_v41 }
 0x193   :  { %1759 = vst [vmem:[%s2804_s7] sm:$0xff] %v1755_v28  ;;  %1760 = vst [vmem:[%s2804_s7 + $0x8] sm:$0xff] %v1756_v26 }
 0x194   :  { %1761 = vst [vmem:[%s2804_s7 + $0x10] sm:$0xff] %v1757_v56  ;;  %1762 = vst [vmem:[%s2804_s7 + $0x18] sm:$0xff] %v1758_v24 }

</bundles_post_ra>
